<compile_context>
chip_gen: v5e
topology: v5e:2x2
jax: 0.10.0
libtpu: 0.0.40
codegen_flags: <defaults>
</compile_context>

<pallas_src>
import jax
import jax.numpy as jnp
from jax import lax
from jax.experimental import pallas as pl
from jax.experimental.pallas import tpu as pltpu


# ----------------------------------------------------------------------------
# Config (small synthetic instance of the module; norm='none', true_skip=True,
# causal=False, pad_mode='reflect', time_extension_ratios all 1, lstm=0)
# ----------------------------------------------------------------------------
CFG = dict(
    space_dim=16,
    dimension=8,
    n_filters=4,
    n_residual_layers=2,
    ratios=[2, 2],                # channel-growth ratios (reversed internally)
    kernel_size=7,
    updownsample_kernel_size=2,
    last_kernel_size=7,
    residual_kernel_size=3,
    dilation_base=2,
    compress=2,
    tr_emb_dim=8,
)


def _elu(x):
    # nn.ELU(alpha=1.0); min() keeps exp() finite on the unselected branch.
    return jnp.where(x > 0, x, jnp.exp(jnp.minimum(x, 0.0)) - 1.0)


def _layer_plan(cfg):
    """Static, ordered description of every StreamableConv1d in the encoder."""
    plan = [dict(name="conv0", k=cfg["kernel_size"], dil=1, pre_elu=False,
                 kind="plain", cin=cfg["space_dim"], cout=cfg["n_filters"])]
    cur = cfg["n_filters"]
    for i, ratio in enumerate(reversed(cfg["ratios"])):
        hidden = cur // cfg["compress"]
        for j in range(cfg["n_residual_layers"]):
            plan.append(dict(name=f"res{i}_{j}_1", k=cfg["residual_kernel_size"],
                             dil=cfg["dilation_base"] ** j, pre_elu=True,
                             kind="res_in", cin=cur, cout=hidden))
            plan.append(dict(name=f"res{i}_{j}_2", k=1, dil=1, pre_elu=True,
                             kind="res_out", cin=hidden, cout=cur))
        nxt = cur * ratio
        plan.append(dict(name=f"down{i}", k=cfg["updownsample_kernel_size"],
                         dil=1, pre_elu=True, kind="plain", cin=cur, cout=nxt))
        cur = nxt
    plan.append(dict(name="final", k=cfg["last_kernel_size"], dil=1,
                     pre_elu=True, kind="plain", cin=cur, cout=cfg["dimension"]))
    return plan


# ----------------------------------------------------------------------------
# In-kernel building blocks (traced inside the single Pallas kernel)
# ----------------------------------------------------------------------------
def _conv_time_lanes(x_f32, w_ref, b_ref, k_size, dil, t_len):
    """Dilated stride-1 reflect-padded conv on a (Cin, T) time-on-lanes slab.

    Per-tap accumulation: acc_f32 += W_k(bf16) @ shifted_tap(bf16), so the
    conv output N dimension is T (lane-dense), no (K*Cin)-wide im2col slab is
    ever materialized, and the accumulator stays in f32.
    """
    b = b_ref[...]                                              # (Cout, 1) f32
    if k_size == 1:
        return jnp.dot(w_ref[0], x_f32.astype(jnp.bfloat16),
                       preferred_element_type=jnp.float32) + b

    pad_total = (k_size - 1) * dil          # stride == 1 -> extra_padding == 0
    pad_r = pad_total // 2
    pad_l = pad_total - pad_r               # audiocraft non-causal convention

    # Reflect halos: <=3 static single-column lane slices per side + one concat.
    left = [x_f32[:, p:p + 1] for p in range(pad_l, 0, -1)]     # cols pad_l..1
    right = [x_f32[:, t_len - 2 - q:t_len - 1 - q] for q in range(pad_r)]
    xp = jnp.concatenate(left + [x_f32] + right, axis=1)        # (Cin, T+pad)

    acc = None
    for k in range(k_size):                                     # static, K<=7
        tap = xp[:, k * dil:k * dil + t_len].astype(jnp.bfloat16)
        d = jnp.dot(w_ref[k], tap, preferred_element_type=jnp.float32)
        acc = d if acc is None else acc + d
    return acc + b


def _make_encoder_kernel(plan, t_len):
    n_conv = len(plan)

    def kernel(*refs):
        x_ref, tr_ref, emb_w_ref, emb_b_ref = refs[:4]
        conv_refs = refs[4:4 + 2 * n_conv]
        o_ref = refs[4 + 2 * n_conv]

        # Fused `x + emb_linear(tr).transpose(1,2)` in time-on-lanes layout:
        # emb = W(S,E) @ tr(E,T) -> (S,T).
        x = x_ref[...].astype(jnp.float32)
        x = x + jnp.dot(emb_w_ref[...], tr_ref[...],
                        preferred_element_type=jnp.float32) + emb_b_ref[...]

        skip = None
        for li, layer in enumerate(plan):
            w_ref = conv_refs[2 * li]        # (K, Cout, Cin) bf16
            b_ref = conv_refs[2 * li + 1]    # (Cout, 1)      f32
            if layer["kind"] == "res_in":
                skip = x                     # true-skip shortcut of the block
            h = _elu(x) if layer["pre_elu"] else x          # elementwise in f32
            h = _conv_time_lanes(h, w_ref, b_ref, layer["k"], layer["dil"],
                                 t_len)
            x = skip + h if layer["kind"] == "res_out" else h

        o_ref[...] = x.astype(o_ref.dtype)   # (dimension, T): lane-dense store

    return kernel


# ----------------------------------------------------------------------------
# Public wrapper: PyTorch NCT in / NCT out, single pallas_call inside.
# ----------------------------------------------------------------------------
def seanet_fmri_encoder(params, x_nct, tr_bte, cfg):
    """x_nct: (B, space_dim, T);  tr_bte: (B, T, tr_emb_dim) -> (B, dimension, T)."""
    B, S, T = x_nct.shape
    assert S == cfg["space_dim"]
    E = cfg["tr_emb_dim"]
    D = cfg["dimension"]
    plan = _layer_plan(cfg)
    for layer in plan:                       # reflect padding needs pad < T
        pt = (layer["k"] - 1) * layer["dil"]
        assert max(pt - pt // 2, pt // 2) < T, "reflect pad must be < T"

    # NCT is already the kernel's time-on-lanes layout: no activation relayout.
    x_in = x_nct.astype(jnp.float32)                               # (B, S, T)
    tr_in = jnp.transpose(tr_bte, (0, 2, 1)).astype(jnp.float32)   # (B, E, T)

    args = [x_in, tr_in,
            params["emb_w"].astype(jnp.float32),                   # (S, E)
            params["emb_b"].reshape(S, 1).astype(jnp.float32)]
    in_specs = [
        pl.BlockSpec((None, S, T), lambda bi: (bi, 0, 0)),
        pl.BlockSpec((None, E, T), lambda bi: (bi, 0, 0)),
        pl.BlockSpec((S, E), lambda bi: (0, 0)),
        pl.BlockSpec((S, 1), lambda bi: (0, 0)),
    ]
    for layer in plan:
        w = params[layer["name"] + "_w"]                 # (Cout, Cin, K) torch layout
        cout, cin, k = w.shape
        args.append(jnp.transpose(w, (2, 0, 1)).astype(jnp.bfloat16))  # (K,Cout,Cin)
        args.append(params[layer["name"] + "_b"].reshape(cout, 1)
                    .astype(jnp.float32))
        in_specs.append(pl.BlockSpec((k, cout, cin), lambda bi: (0, 0, 0)))
        in_specs.append(pl.BlockSpec((cout, 1), lambda bi: (0, 0)))

    # ~96 MiB on v5e/v6e (128 MiB physical), ~48 MiB on v7x (64 MiB physical).
    try:
        vmem_cap = pltpu.get_tpu_info().vmem_capacity_bytes
    except Exception:
        vmem_cap = 64 * 1024 * 1024
    vmem_limit = min(int(0.75 * vmem_cap), 100 * 1024 * 1024)

    return pl.pallas_call(
        _make_encoder_kernel(plan, T),
        out_shape=jax.ShapeDtypeStruct((B, D, T), x_nct.dtype),
        grid=(B,),                                   # batch axis, megacore-parallel
        in_specs=in_specs,
        out_specs=pl.BlockSpec((None, D, T), lambda bi: (bi, 0, 0)),
        compiler_params=pltpu.CompilerParams(
            dimension_semantics=("parallel",),
            vmem_limit_bytes=vmem_limit),
    )(*args)


# ----------------------------------------------------------------------------
# Parameter init + pure-JAX reference (independent formulation, for checking)
# ----------------------------------------------------------------------------
def init_params(key, cfg):
    plan = _layer_plan(cfg)
    keys = jax.random.split(key, 2 * len(plan) + 2)
    params = {
        "emb_w": 0.1 * jax.random.normal(                 # nn.Linear weight (S, E)
            keys[0], (cfg["space_dim"], cfg["tr_emb_dim"]), jnp.float32),
        "emb_b": 0.1 * jax.random.normal(
            keys[1], (cfg["space_dim"],), jnp.float32),
    }
    for n, layer in enumerate(plan):                      # Conv1d weight (Cout,Cin,K)
        kw, kb = keys[2 + 2 * n], keys[3 + 2 * n]
        params[layer["name"] + "_w"] = 0.1 * jax.random.normal(
            kw, (layer["cout"], layer["cin"], layer["k"]), jnp.float32)
        params[layer["name"] + "_b"] = 0.1 * jax.random.normal(
            kb, (layer["cout"],), jnp.float32)
    return params


def _ref_conv1d_nct(x_bct, w_oik, bias, dilation=1):
    K = w_oik.shape[-1]
    T = x_bct.shape[-1]
    pad_total = (K - 1) * dilation
    pad_r = pad_total // 2
    pad_l = pad_total - pad_r
    xp = (jnp.pad(x_bct, ((0, 0), (0, 0), (pad_l, pad_r)), mode="reflect")
          if pad_total else x_bct)
    y = bias[None, :, None]
    for k in range(K):
        y = y + jnp.einsum("bct,oc->bot",
                           xp[:, :, k * dilation:k * dilation + T],
                           w_oik[:, :, k], precision=lax.Precision.HIGHEST)
    return y


def _ref_forward(params, x_nct, tr_bte, cfg):
    emb = jnp.einsum("bte,se->bst", tr_bte, params["emb_w"],
                     precision=lax.Precision.HIGHEST)
    x = x_nct + emb + params["emb_b"][None, :, None]
    x = _ref_conv1d_nct(x, params["conv0_w"], params["conv0_b"])
    for i, _ratio in enumerate(reversed(cfg["ratios"])):
        for j in range(cfg["n_residual_layers"]):
            dil = cfg["dilation_base"] ** j
            h = _ref_conv1d_nct(_elu(x), params[f"res{i}_{j}_1_w"],
                                params[f"res{i}_{j}_1_b"], dil)
            h = _ref_conv1d_nct(_elu(h), params[f"res{i}_{j}_2_w"],
                                params[f"res{i}_{j}_2_b"], 1)
            x = x + h
        x = _ref_conv1d_nct(_elu(x), params[f"down{i}_w"], params[f"down{i}_b"], 1)
    x = _ref_conv1d_nct(_elu(x), params["final_w"], params["final_b"], 1)
    return x


if __name__ == "__main__":
    B, T = 2, 128          # T = 128 -> lane-dense activations/output
    key = jax.random.PRNGKey(0)
    kx, ktr, kp = jax.random.split(key, 3)

    x = jax.random.normal(kx, (B, CFG["space_dim"], T), jnp.float32)     # NCT
    tr = jax.random.normal(ktr, (B, T, CFG["tr_emb_dim"]), jnp.float32)
    params = init_params(kp, CFG)

    fwd = jax.jit(lambda p, xx, tt: seanet_fmri_encoder(p, xx, tt, CFG))
    out = jax.block_until_ready(fwd(params, x, tr))

    assert out.shape == (B, CFG["dimension"], T), out.shape
    assert bool(jnp.all(jnp.isfinite(out)))

    # Independent pure-JAX reference (HIGHEST precision); loose tol covers the
    # kernel's bf16 MXU matmuls chained across 13 layers.
    ref = _ref_forward(params, x, tr, CFG)
    err = float(jnp.max(jnp.abs(out - ref)))
    assert err < 5e-2, f"kernel vs reference max abs err {err}"

    print("KERNEL_OK")
</pallas_src>

<mosaic_0001>
module attributes {stable_mosaic.version = 11 : i64} {
  func.func @kernel(%arg0: i32, %arg1: memref<1x16x128xf32, #tpu.memory_space<vmem>>, %arg2: memref<1x8x128xf32, #tpu.memory_space<vmem>>, %arg3: memref<16x8xf32, #tpu.memory_space<vmem>>, %arg4: memref<16x1xf32, #tpu.memory_space<vmem>>, %arg5: memref<7x4x16xbf16, #tpu.memory_space<vmem>>, %arg6: memref<4x1xf32, #tpu.memory_space<vmem>>, %arg7: memref<3x2x4xbf16, #tpu.memory_space<vmem>>, %arg8: memref<2x1xf32, #tpu.memory_space<vmem>>, %arg9: memref<1x4x2xbf16, #tpu.memory_space<vmem>>, %arg10: memref<4x1xf32, #tpu.memory_space<vmem>>, %arg11: memref<3x2x4xbf16, #tpu.memory_space<vmem>>, %arg12: memref<2x1xf32, #tpu.memory_space<vmem>>, %arg13: memref<1x4x2xbf16, #tpu.memory_space<vmem>>, %arg14: memref<4x1xf32, #tpu.memory_space<vmem>>, %arg15: memref<2x8x4xbf16, #tpu.memory_space<vmem>>, %arg16: memref<8x1xf32, #tpu.memory_space<vmem>>, %arg17: memref<3x4x8xbf16, #tpu.memory_space<vmem>>, %arg18: memref<4x1xf32, #tpu.memory_space<vmem>>, %arg19: memref<1x8x4xbf16, #tpu.memory_space<vmem>>, %arg20: memref<8x1xf32, #tpu.memory_space<vmem>>, %arg21: memref<3x4x8xbf16, #tpu.memory_space<vmem>>, %arg22: memref<4x1xf32, #tpu.memory_space<vmem>>, %arg23: memref<1x8x4xbf16, #tpu.memory_space<vmem>>, %arg24: memref<8x1xf32, #tpu.memory_space<vmem>>, %arg25: memref<2x16x8xbf16, #tpu.memory_space<vmem>>, %arg26: memref<16x1xf32, #tpu.memory_space<vmem>>, %arg27: memref<7x8x16xbf16, #tpu.memory_space<vmem>>, %arg28: memref<8x1xf32, #tpu.memory_space<vmem>>, %arg29: memref<1x8x128xf32, #tpu.memory_space<vmem>>) attributes {dimension_semantics = [#tpu.dimension_semantics<parallel>], iteration_bounds = array<i64: 2>, scalar_prefetch = 0 : i64, scratch_operands = 0 : i64, tpu.core_type = #tpu.core_type<tc>, window_params = [{transform_indices = @transform_0, window_bounds = array<i64: 1, 16, 128>}, {transform_indices = @transform_1, window_bounds = array<i64: 1, 8, 128>}, {pipeline_mode = #tpu.pipeline_mode<synchronous>, transform_indices = @transform_2, window_bounds = array<i64: 16, 8>}, {pipeline_mode = #tpu.pipeline_mode<synchronous>, transform_indices = @transform_3, window_bounds = array<i64: 16, 1>}, {pipeline_mode = #tpu.pipeline_mode<synchronous>, transform_indices = @transform_4, window_bounds = array<i64: 7, 4, 16>}, {pipeline_mode = #tpu.pipeline_mode<synchronous>, transform_indices = @transform_5, window_bounds = array<i64: 4, 1>}, {pipeline_mode = #tpu.pipeline_mode<synchronous>, transform_indices = @transform_6, window_bounds = array<i64: 3, 2, 4>}, {pipeline_mode = #tpu.pipeline_mode<synchronous>, transform_indices = @transform_7, window_bounds = array<i64: 2, 1>}, {pipeline_mode = #tpu.pipeline_mode<synchronous>, transform_indices = @transform_8, window_bounds = array<i64: 1, 4, 2>}, {pipeline_mode = #tpu.pipeline_mode<synchronous>, transform_indices = @transform_9, window_bounds = array<i64: 4, 1>}, {pipeline_mode = #tpu.pipeline_mode<synchronous>, transform_indices = @transform_10, window_bounds = array<i64: 3, 2, 4>}, {pipeline_mode = #tpu.pipeline_mode<synchronous>, transform_indices = @transform_11, window_bounds = array<i64: 2, 1>}, {pipeline_mode = #tpu.pipeline_mode<synchronous>, transform_indices = @transform_12, window_bounds = array<i64: 1, 4, 2>}, {pipeline_mode = #tpu.pipeline_mode<synchronous>, transform_indices = @transform_13, window_bounds = array<i64: 4, 1>}, {pipeline_mode = #tpu.pipeline_mode<synchronous>, transform_indices = @transform_14, window_bounds = array<i64: 2, 8, 4>}, {pipeline_mode = #tpu.pipeline_mode<synchronous>, transform_indices = @transform_15, window_bounds = array<i64: 8, 1>}, {pipeline_mode = #tpu.pipeline_mode<synchronous>, transform_indices = @transform_16, window_bounds = array<i64: 3, 4, 8>}, {pipeline_mode = #tpu.pipeline_mode<synchronous>, transform_indices = @transform_17, window_bounds = array<i64: 4, 1>}, {pipeline_mode = #tpu.pipeline_mode<synchronous>, transform_indices = @transform_18, window_bounds = array<i64: 1, 8, 4>}, {pipeline_mode = #tpu.pipeline_mode<synchronous>, transform_indices = @transform_19, window_bounds = array<i64: 8, 1>}, {pipeline_mode = #tpu.pipeline_mode<synchronous>, transform_indices = @transform_20, window_bounds = array<i64: 3, 4, 8>}, {pipeline_mode = #tpu.pipeline_mode<synchronous>, transform_indices = @transform_21, window_bounds = array<i64: 4, 1>}, {pipeline_mode = #tpu.pipeline_mode<synchronous>, transform_indices = @transform_22, window_bounds = array<i64: 1, 8, 4>}, {pipeline_mode = #tpu.pipeline_mode<synchronous>, transform_indices = @transform_23, window_bounds = array<i64: 8, 1>}, {pipeline_mode = #tpu.pipeline_mode<synchronous>, transform_indices = @transform_24, window_bounds = array<i64: 2, 16, 8>}, {pipeline_mode = #tpu.pipeline_mode<synchronous>, transform_indices = @transform_25, window_bounds = array<i64: 16, 1>}, {pipeline_mode = #tpu.pipeline_mode<synchronous>, transform_indices = @transform_26, window_bounds = array<i64: 7, 8, 16>}, {pipeline_mode = #tpu.pipeline_mode<synchronous>, transform_indices = @transform_27, window_bounds = array<i64: 8, 1>}, {transform_indices = @transform_28, window_bounds = array<i64: 1, 8, 128>}]} {
    %c0 = arith.constant 0 : index
    %c0_0 = arith.constant 0 : index
    %c0_1 = arith.constant 0 : index
    %0 = vector.load %arg1[%c0, %c0_0, %c0_1] : memref<1x16x128xf32, #tpu.memory_space<vmem>>, vector<1x16x128xf32>
    %1 = vector.shape_cast %0 : vector<1x16x128xf32> to vector<16x128xf32>
    %c0_2 = arith.constant 0 : index
    %c0_3 = arith.constant 0 : index
    %2 = vector.load %arg3[%c0_2, %c0_3] : memref<16x8xf32, #tpu.memory_space<vmem>>, vector<16x8xf32>
    %c0_4 = arith.constant 0 : index
    %c0_5 = arith.constant 0 : index
    %c0_6 = arith.constant 0 : index
    %3 = vector.load %arg2[%c0_4, %c0_5, %c0_6] : memref<1x8x128xf32, #tpu.memory_space<vmem>>, vector<1x8x128xf32>
    %4 = vector.shape_cast %3 : vector<1x8x128xf32> to vector<8x128xf32>
    %cst = arith.constant dense<0.000000e+00> : vector<16x128xf32>
    %5 = tpu.matmul %2, %4, %cst {dimension_numbers = #tpu.dot_dimension_numbers<[1], [0], [0], [1], [0, 0, 1, 1], [], []>} : vector<16x8xf32>, vector<8x128xf32>, vector<16x128xf32> -> vector<16x128xf32>
    %6 = arith.addf %1, %5 : vector<16x128xf32>
    %c0_7 = arith.constant 0 : index
    %c0_8 = arith.constant 0 : index
    %7 = vector.load %arg4[%c0_7, %c0_8] : memref<16x1xf32, #tpu.memory_space<vmem>>, vector<16x1xf32>
    %8 = vector.broadcast %7 : vector<16x1xf32> to vector<16x128xf32>
    %9 = arith.addf %6, %8 : vector<16x128xf32>
    %c0_9 = arith.constant 0 : index
    %c0_10 = arith.constant 0 : index
    %10 = vector.load %arg6[%c0_9, %c0_10] : memref<4x1xf32, #tpu.memory_space<vmem>>, vector<4x1xf32>
    %11 = vector.extract_strided_slice %9 {offsets = [0, 3], sizes = [16, 1], strides = [1, 1]} : vector<16x128xf32> to vector<16x1xf32>
    %12 = vector.extract_strided_slice %9 {offsets = [0, 2], sizes = [16, 1], strides = [1, 1]} : vector<16x128xf32> to vector<16x1xf32>
    %13 = vector.extract_strided_slice %9 {offsets = [0, 1], sizes = [16, 1], strides = [1, 1]} : vector<16x128xf32> to vector<16x1xf32>
    %14 = vector.extract_strided_slice %9 {offsets = [0, 126], sizes = [16, 1], strides = [1, 1]} : vector<16x128xf32> to vector<16x1xf32>
    %15 = vector.extract_strided_slice %9 {offsets = [0, 125], sizes = [16, 1], strides = [1, 1]} : vector<16x128xf32> to vector<16x1xf32>
    %16 = vector.extract_strided_slice %9 {offsets = [0, 124], sizes = [16, 1], strides = [1, 1]} : vector<16x128xf32> to vector<16x1xf32>
    %17 = tpu.concatenate %11, %12, %13, %9, %14, %15, %16 in 1 : vector<16x1xf32>, vector<16x1xf32>, vector<16x1xf32>, vector<16x128xf32>, vector<16x1xf32>, vector<16x1xf32>, vector<16x1xf32> -> vector<16x134xf32>
    %18 = vector.extract_strided_slice %17 {offsets = [0, 0], sizes = [16, 128], strides = [1, 1]} : vector<16x134xf32> to vector<16x128xf32>
    %19 = arith.truncf %18 : vector<16x128xf32> to vector<16x128xbf16>
    %c0_11 = arith.constant 0 : index
    %c0_12 = arith.constant 0 : index
    %c0_13 = arith.constant 0 : index
    %20 = vector.load %arg5[%c0_11, %c0_12, %c0_13] : memref<7x4x16xbf16, #tpu.memory_space<vmem>>, vector<1x4x16xbf16>
    %21 = vector.shape_cast %20 : vector<1x4x16xbf16> to vector<4x16xbf16>
    %cst_14 = arith.constant dense<0.000000e+00> : vector<4x128xf32>
    %22 = tpu.matmul %21, %19, %cst_14 {dimension_numbers = #tpu.dot_dimension_numbers<[1], [0], [0], [1], [0, 0, 1, 1], [], []>} : vector<4x16xbf16>, vector<16x128xbf16>, vector<4x128xf32> -> vector<4x128xf32>
    %23 = vector.extract_strided_slice %17 {offsets = [0, 1], sizes = [16, 128], strides = [1, 1]} : vector<16x134xf32> to vector<16x128xf32>
    %24 = arith.truncf %23 : vector<16x128xf32> to vector<16x128xbf16>
    %c1 = arith.constant 1 : index
    %c0_15 = arith.constant 0 : index
    %c0_16 = arith.constant 0 : index
    %25 = vector.load %arg5[%c1, %c0_15, %c0_16] : memref<7x4x16xbf16, #tpu.memory_space<vmem>>, vector<1x4x16xbf16>
    %26 = vector.shape_cast %25 : vector<1x4x16xbf16> to vector<4x16xbf16>
    %cst_17 = arith.constant dense<0.000000e+00> : vector<4x128xf32>
    %27 = tpu.matmul %26, %24, %cst_17 {dimension_numbers = #tpu.dot_dimension_numbers<[1], [0], [0], [1], [0, 0, 1, 1], [], []>} : vector<4x16xbf16>, vector<16x128xbf16>, vector<4x128xf32> -> vector<4x128xf32>
    %28 = arith.addf %22, %27 : vector<4x128xf32>
    %29 = vector.extract_strided_slice %17 {offsets = [0, 2], sizes = [16, 128], strides = [1, 1]} : vector<16x134xf32> to vector<16x128xf32>
    %30 = arith.truncf %29 : vector<16x128xf32> to vector<16x128xbf16>
    %c2 = arith.constant 2 : index
    %c0_18 = arith.constant 0 : index
    %c0_19 = arith.constant 0 : index
    %31 = vector.load %arg5[%c2, %c0_18, %c0_19] : memref<7x4x16xbf16, #tpu.memory_space<vmem>>, vector<1x4x16xbf16>
    %32 = vector.shape_cast %31 : vector<1x4x16xbf16> to vector<4x16xbf16>
    %cst_20 = arith.constant dense<0.000000e+00> : vector<4x128xf32>
    %33 = tpu.matmul %32, %30, %cst_20 {dimension_numbers = #tpu.dot_dimension_numbers<[1], [0], [0], [1], [0, 0, 1, 1], [], []>} : vector<4x16xbf16>, vector<16x128xbf16>, vector<4x128xf32> -> vector<4x128xf32>
    %34 = arith.addf %28, %33 : vector<4x128xf32>
    %35 = vector.extract_strided_slice %17 {offsets = [0, 3], sizes = [16, 128], strides = [1, 1]} : vector<16x134xf32> to vector<16x128xf32>
    %36 = arith.truncf %35 : vector<16x128xf32> to vector<16x128xbf16>
    %c3 = arith.constant 3 : index
    %c0_21 = arith.constant 0 : index
    %c0_22 = arith.constant 0 : index
    %37 = vector.load %arg5[%c3, %c0_21, %c0_22] : memref<7x4x16xbf16, #tpu.memory_space<vmem>>, vector<1x4x16xbf16>
    %38 = vector.shape_cast %37 : vector<1x4x16xbf16> to vector<4x16xbf16>
    %cst_23 = arith.constant dense<0.000000e+00> : vector<4x128xf32>
    %39 = tpu.matmul %38, %36, %cst_23 {dimension_numbers = #tpu.dot_dimension_numbers<[1], [0], [0], [1], [0, 0, 1, 1], [], []>} : vector<4x16xbf16>, vector<16x128xbf16>, vector<4x128xf32> -> vector<4x128xf32>
    %40 = arith.addf %34, %39 : vector<4x128xf32>
    %41 = vector.extract_strided_slice %17 {offsets = [0, 4], sizes = [16, 128], strides = [1, 1]} : vector<16x134xf32> to vector<16x128xf32>
    %42 = arith.truncf %41 : vector<16x128xf32> to vector<16x128xbf16>
    %c4 = arith.constant 4 : index
    %c0_24 = arith.constant 0 : index
    %c0_25 = arith.constant 0 : index
    %43 = vector.load %arg5[%c4, %c0_24, %c0_25] : memref<7x4x16xbf16, #tpu.memory_space<vmem>>, vector<1x4x16xbf16>
    %44 = vector.shape_cast %43 : vector<1x4x16xbf16> to vector<4x16xbf16>
    %cst_26 = arith.constant dense<0.000000e+00> : vector<4x128xf32>
    %45 = tpu.matmul %44, %42, %cst_26 {dimension_numbers = #tpu.dot_dimension_numbers<[1], [0], [0], [1], [0, 0, 1, 1], [], []>} : vector<4x16xbf16>, vector<16x128xbf16>, vector<4x128xf32> -> vector<4x128xf32>
    %46 = arith.addf %40, %45 : vector<4x128xf32>
    %47 = vector.extract_strided_slice %17 {offsets = [0, 5], sizes = [16, 128], strides = [1, 1]} : vector<16x134xf32> to vector<16x128xf32>
    %48 = arith.truncf %47 : vector<16x128xf32> to vector<16x128xbf16>
    %c5 = arith.constant 5 : index
    %c0_27 = arith.constant 0 : index
    %c0_28 = arith.constant 0 : index
    %49 = vector.load %arg5[%c5, %c0_27, %c0_28] : memref<7x4x16xbf16, #tpu.memory_space<vmem>>, vector<1x4x16xbf16>
    %50 = vector.shape_cast %49 : vector<1x4x16xbf16> to vector<4x16xbf16>
    %cst_29 = arith.constant dense<0.000000e+00> : vector<4x128xf32>
    %51 = tpu.matmul %50, %48, %cst_29 {dimension_numbers = #tpu.dot_dimension_numbers<[1], [0], [0], [1], [0, 0, 1, 1], [], []>} : vector<4x16xbf16>, vector<16x128xbf16>, vector<4x128xf32> -> vector<4x128xf32>
    %52 = arith.addf %46, %51 : vector<4x128xf32>
    %53 = vector.extract_strided_slice %17 {offsets = [0, 6], sizes = [16, 128], strides = [1, 1]} : vector<16x134xf32> to vector<16x128xf32>
    %54 = arith.truncf %53 : vector<16x128xf32> to vector<16x128xbf16>
    %c6 = arith.constant 6 : index
    %c0_30 = arith.constant 0 : index
    %c0_31 = arith.constant 0 : index
    %55 = vector.load %arg5[%c6, %c0_30, %c0_31] : memref<7x4x16xbf16, #tpu.memory_space<vmem>>, vector<1x4x16xbf16>
    %56 = vector.shape_cast %55 : vector<1x4x16xbf16> to vector<4x16xbf16>
    %cst_32 = arith.constant dense<0.000000e+00> : vector<4x128xf32>
    %57 = tpu.matmul %56, %54, %cst_32 {dimension_numbers = #tpu.dot_dimension_numbers<[1], [0], [0], [1], [0, 0, 1, 1], [], []>} : vector<4x16xbf16>, vector<16x128xbf16>, vector<4x128xf32> -> vector<4x128xf32>
    %58 = arith.addf %52, %57 : vector<4x128xf32>
    %59 = vector.broadcast %10 : vector<4x1xf32> to vector<4x128xf32>
    %60 = arith.addf %58, %59 : vector<4x128xf32>
    %cst_33 = arith.constant 0.000000e+00 : f32
    %61 = vector.broadcast %cst_33 : f32 to vector<4x128xf32>
    %62 = arith.cmpf ogt, %60, %61 : vector<4x128xf32>
    %cst_34 = arith.constant 0.000000e+00 : f32
    %63 = vector.broadcast %cst_34 : f32 to vector<4x128xf32>
    %64 = arith.minimumf %60, %63 : vector<4x128xf32>
    %65 = math.exp %64 : vector<4x128xf32>
    %cst_35 = arith.constant 1.000000e+00 : f32
    %66 = vector.broadcast %cst_35 : f32 to vector<4x128xf32>
    %67 = arith.subf %65, %66 : vector<4x128xf32>
    %68 = arith.select %62, %60, %67 : vector<4x128xi1>, vector<4x128xf32>
    %c0_36 = arith.constant 0 : index
    %c0_37 = arith.constant 0 : index
    %69 = vector.load %arg8[%c0_36, %c0_37] : memref<2x1xf32, #tpu.memory_space<vmem>>, vector<2x1xf32>
    %70 = vector.extract_strided_slice %68 {offsets = [0, 1], sizes = [4, 1], strides = [1, 1]} : vector<4x128xf32> to vector<4x1xf32>
    %71 = vector.extract_strided_slice %68 {offsets = [0, 126], sizes = [4, 1], strides = [1, 1]} : vector<4x128xf32> to vector<4x1xf32>
    %72 = tpu.concatenate %70, %68, %71 in 1 : vector<4x1xf32>, vector<4x128xf32>, vector<4x1xf32> -> vector<4x130xf32>
    %73 = vector.extract_strided_slice %72 {offsets = [0, 0], sizes = [4, 128], strides = [1, 1]} : vector<4x130xf32> to vector<4x128xf32>
    %74 = arith.truncf %73 : vector<4x128xf32> to vector<4x128xbf16>
    %c0_38 = arith.constant 0 : index
    %c0_39 = arith.constant 0 : index
    %c0_40 = arith.constant 0 : index
    %75 = vector.load %arg7[%c0_38, %c0_39, %c0_40] : memref<3x2x4xbf16, #tpu.memory_space<vmem>>, vector<1x2x4xbf16>
    %76 = vector.shape_cast %75 : vector<1x2x4xbf16> to vector<2x4xbf16>
    %cst_41 = arith.constant dense<0.000000e+00> : vector<2x128xf32>
    %77 = tpu.matmul %76, %74, %cst_41 {dimension_numbers = #tpu.dot_dimension_numbers<[1], [0], [0], [1], [0, 0, 1, 1], [], []>} : vector<2x4xbf16>, vector<4x128xbf16>, vector<2x128xf32> -> vector<2x128xf32>
    %78 = vector.extract_strided_slice %72 {offsets = [0, 1], sizes = [4, 128], strides = [1, 1]} : vector<4x130xf32> to vector<4x128xf32>
    %79 = arith.truncf %78 : vector<4x128xf32> to vector<4x128xbf16>
    %c1_42 = arith.constant 1 : index
    %c0_43 = arith.constant 0 : index
    %c0_44 = arith.constant 0 : index
    %80 = vector.load %arg7[%c1_42, %c0_43, %c0_44] : memref<3x2x4xbf16, #tpu.memory_space<vmem>>, vector<1x2x4xbf16>
    %81 = vector.shape_cast %80 : vector<1x2x4xbf16> to vector<2x4xbf16>
    %cst_45 = arith.constant dense<0.000000e+00> : vector<2x128xf32>
    %82 = tpu.matmul %81, %79, %cst_45 {dimension_numbers = #tpu.dot_dimension_numbers<[1], [0], [0], [1], [0, 0, 1, 1], [], []>} : vector<2x4xbf16>, vector<4x128xbf16>, vector<2x128xf32> -> vector<2x128xf32>
    %83 = arith.addf %77, %82 : vector<2x128xf32>
    %84 = vector.extract_strided_slice %72 {offsets = [0, 2], sizes = [4, 128], strides = [1, 1]} : vector<4x130xf32> to vector<4x128xf32>
    %85 = arith.truncf %84 : vector<4x128xf32> to vector<4x128xbf16>
    %c2_46 = arith.constant 2 : index
    %c0_47 = arith.constant 0 : index
    %c0_48 = arith.constant 0 : index
    %86 = vector.load %arg7[%c2_46, %c0_47, %c0_48] : memref<3x2x4xbf16, #tpu.memory_space<vmem>>, vector<1x2x4xbf16>
    %87 = vector.shape_cast %86 : vector<1x2x4xbf16> to vector<2x4xbf16>
    %cst_49 = arith.constant dense<0.000000e+00> : vector<2x128xf32>
    %88 = tpu.matmul %87, %85, %cst_49 {dimension_numbers = #tpu.dot_dimension_numbers<[1], [0], [0], [1], [0, 0, 1, 1], [], []>} : vector<2x4xbf16>, vector<4x128xbf16>, vector<2x128xf32> -> vector<2x128xf32>
    %89 = arith.addf %83, %88 : vector<2x128xf32>
    %90 = vector.broadcast %69 : vector<2x1xf32> to vector<2x128xf32>
    %91 = arith.addf %89, %90 : vector<2x128xf32>
    %cst_50 = arith.constant 0.000000e+00 : f32
    %92 = vector.broadcast %cst_50 : f32 to vector<2x128xf32>
    %93 = arith.cmpf ogt, %91, %92 : vector<2x128xf32>
    %cst_51 = arith.constant 0.000000e+00 : f32
    %94 = vector.broadcast %cst_51 : f32 to vector<2x128xf32>
    %95 = arith.minimumf %91, %94 : vector<2x128xf32>
    %96 = math.exp %95 : vector<2x128xf32>
    %cst_52 = arith.constant 1.000000e+00 : f32
    %97 = vector.broadcast %cst_52 : f32 to vector<2x128xf32>
    %98 = arith.subf %96, %97 : vector<2x128xf32>
    %99 = arith.select %93, %91, %98 : vector<2x128xi1>, vector<2x128xf32>
    %c0_53 = arith.constant 0 : index
    %c0_54 = arith.constant 0 : index
    %100 = vector.load %arg10[%c0_53, %c0_54] : memref<4x1xf32, #tpu.memory_space<vmem>>, vector<4x1xf32>
    %c0_55 = arith.constant 0 : index
    %c0_56 = arith.constant 0 : index
    %c0_57 = arith.constant 0 : index
    %101 = vector.load %arg9[%c0_55, %c0_56, %c0_57] : memref<1x4x2xbf16, #tpu.memory_space<vmem>>, vector<1x4x2xbf16>
    %102 = vector.shape_cast %101 : vector<1x4x2xbf16> to vector<4x2xbf16>
    %103 = arith.truncf %99 : vector<2x128xf32> to vector<2x128xbf16>
    %cst_58 = arith.constant dense<0.000000e+00> : vector<4x128xf32>
    %104 = tpu.matmul %102, %103, %cst_58 {dimension_numbers = #tpu.dot_dimension_numbers<[1], [0], [0], [1], [0, 0, 1, 1], [], []>} : vector<4x2xbf16>, vector<2x128xbf16>, vector<4x128xf32> -> vector<4x128xf32>
    %105 = vector.broadcast %100 : vector<4x1xf32> to vector<4x128xf32>
    %106 = arith.addf %104, %105 : vector<4x128xf32>
    %107 = arith.addf %60, %106 : vector<4x128xf32>
    %cst_59 = arith.constant 0.000000e+00 : f32
    %108 = vector.broadcast %cst_59 : f32 to vector<4x128xf32>
    %109 = arith.cmpf ogt, %107, %108 : vector<4x128xf32>
    %cst_60 = arith.constant 0.000000e+00 : f32
    %110 = vector.broadcast %cst_60 : f32 to vector<4x128xf32>
    %111 = arith.minimumf %107, %110 : vector<4x128xf32>
    %112 = math.exp %111 : vector<4x128xf32>
    %cst_61 = arith.constant 1.000000e+00 : f32
    %113 = vector.broadcast %cst_61 : f32 to vector<4x128xf32>
    %114 = arith.subf %112, %113 : vector<4x128xf32>
    %115 = arith.select %109, %107, %114 : vector<4x128xi1>, vector<4x128xf32>
    %c0_62 = arith.constant 0 : index
    %c0_63 = arith.constant 0 : index
    %116 = vector.load %arg12[%c0_62, %c0_63] : memref<2x1xf32, #tpu.memory_space<vmem>>, vector<2x1xf32>
    %117 = vector.extract_strided_slice %115 {offsets = [0, 2], sizes = [4, 1], strides = [1, 1]} : vector<4x128xf32> to vector<4x1xf32>
    %118 = vector.extract_strided_slice %115 {offsets = [0, 1], sizes = [4, 1], strides = [1, 1]} : vector<4x128xf32> to vector<4x1xf32>
    %119 = vector.extract_strided_slice %115 {offsets = [0, 126], sizes = [4, 1], strides = [1, 1]} : vector<4x128xf32> to vector<4x1xf32>
    %120 = vector.extract_strided_slice %115 {offsets = [0, 125], sizes = [4, 1], strides = [1, 1]} : vector<4x128xf32> to vector<4x1xf32>
    %121 = tpu.concatenate %117, %118, %115, %119, %120 in 1 : vector<4x1xf32>, vector<4x1xf32>, vector<4x128xf32>, vector<4x1xf32>, vector<4x1xf32> -> vector<4x132xf32>
    %122 = vector.extract_strided_slice %121 {offsets = [0, 0], sizes = [4, 128], strides = [1, 1]} : vector<4x132xf32> to vector<4x128xf32>
    %123 = arith.truncf %122 : vector<4x128xf32> to vector<4x128xbf16>
    %c0_64 = arith.constant 0 : index
    %c0_65 = arith.constant 0 : index
    %c0_66 = arith.constant 0 : index
    %124 = vector.load %arg11[%c0_64, %c0_65, %c0_66] : memref<3x2x4xbf16, #tpu.memory_space<vmem>>, vector<1x2x4xbf16>
    %125 = vector.shape_cast %124 : vector<1x2x4xbf16> to vector<2x4xbf16>
    %cst_67 = arith.constant dense<0.000000e+00> : vector<2x128xf32>
    %126 = tpu.matmul %125, %123, %cst_67 {dimension_numbers = #tpu.dot_dimension_numbers<[1], [0], [0], [1], [0, 0, 1, 1], [], []>} : vector<2x4xbf16>, vector<4x128xbf16>, vector<2x128xf32> -> vector<2x128xf32>
    %127 = vector.extract_strided_slice %121 {offsets = [0, 2], sizes = [4, 128], strides = [1, 1]} : vector<4x132xf32> to vector<4x128xf32>
    %128 = arith.truncf %127 : vector<4x128xf32> to vector<4x128xbf16>
    %c1_68 = arith.constant 1 : index
    %c0_69 = arith.constant 0 : index
    %c0_70 = arith.constant 0 : index
    %129 = vector.load %arg11[%c1_68, %c0_69, %c0_70] : memref<3x2x4xbf16, #tpu.memory_space<vmem>>, vector<1x2x4xbf16>
    %130 = vector.shape_cast %129 : vector<1x2x4xbf16> to vector<2x4xbf16>
    %cst_71 = arith.constant dense<0.000000e+00> : vector<2x128xf32>
    %131 = tpu.matmul %130, %128, %cst_71 {dimension_numbers = #tpu.dot_dimension_numbers<[1], [0], [0], [1], [0, 0, 1, 1], [], []>} : vector<2x4xbf16>, vector<4x128xbf16>, vector<2x128xf32> -> vector<2x128xf32>
    %132 = arith.addf %126, %131 : vector<2x128xf32>
    %133 = vector.extract_strided_slice %121 {offsets = [0, 4], sizes = [4, 128], strides = [1, 1]} : vector<4x132xf32> to vector<4x128xf32>
    %134 = arith.truncf %133 : vector<4x128xf32> to vector<4x128xbf16>
    %c2_72 = arith.constant 2 : index
    %c0_73 = arith.constant 0 : index
    %c0_74 = arith.constant 0 : index
    %135 = vector.load %arg11[%c2_72, %c0_73, %c0_74] : memref<3x2x4xbf16, #tpu.memory_space<vmem>>, vector<1x2x4xbf16>
    %136 = vector.shape_cast %135 : vector<1x2x4xbf16> to vector<2x4xbf16>
    %cst_75 = arith.constant dense<0.000000e+00> : vector<2x128xf32>
    %137 = tpu.matmul %136, %134, %cst_75 {dimension_numbers = #tpu.dot_dimension_numbers<[1], [0], [0], [1], [0, 0, 1, 1], [], []>} : vector<2x4xbf16>, vector<4x128xbf16>, vector<2x128xf32> -> vector<2x128xf32>
    %138 = arith.addf %132, %137 : vector<2x128xf32>
    %139 = vector.broadcast %116 : vector<2x1xf32> to vector<2x128xf32>
    %140 = arith.addf %138, %139 : vector<2x128xf32>
    %cst_76 = arith.constant 0.000000e+00 : f32
    %141 = vector.broadcast %cst_76 : f32 to vector<2x128xf32>
    %142 = arith.cmpf ogt, %140, %141 : vector<2x128xf32>
    %cst_77 = arith.constant 0.000000e+00 : f32
    %143 = vector.broadcast %cst_77 : f32 to vector<2x128xf32>
    %144 = arith.minimumf %140, %143 : vector<2x128xf32>
    %145 = math.exp %144 : vector<2x128xf32>
    %cst_78 = arith.constant 1.000000e+00 : f32
    %146 = vector.broadcast %cst_78 : f32 to vector<2x128xf32>
    %147 = arith.subf %145, %146 : vector<2x128xf32>
    %148 = arith.select %142, %140, %147 : vector<2x128xi1>, vector<2x128xf32>
    %c0_79 = arith.constant 0 : index
    %c0_80 = arith.constant 0 : index
    %149 = vector.load %arg14[%c0_79, %c0_80] : memref<4x1xf32, #tpu.memory_space<vmem>>, vector<4x1xf32>
    %c0_81 = arith.constant 0 : index
    %c0_82 = arith.constant 0 : index
    %c0_83 = arith.constant 0 : index
    %150 = vector.load %arg13[%c0_81, %c0_82, %c0_83] : memref<1x4x2xbf16, #tpu.memory_space<vmem>>, vector<1x4x2xbf16>
    %151 = vector.shape_cast %150 : vector<1x4x2xbf16> to vector<4x2xbf16>
    %152 = arith.truncf %148 : vector<2x128xf32> to vector<2x128xbf16>
    %cst_84 = arith.constant dense<0.000000e+00> : vector<4x128xf32>
    %153 = tpu.matmul %151, %152, %cst_84 {dimension_numbers = #tpu.dot_dimension_numbers<[1], [0], [0], [1], [0, 0, 1, 1], [], []>} : vector<4x2xbf16>, vector<2x128xbf16>, vector<4x128xf32> -> vector<4x128xf32>
    %154 = vector.broadcast %149 : vector<4x1xf32> to vector<4x128xf32>
    %155 = arith.addf %153, %154 : vector<4x128xf32>
    %156 = arith.addf %107, %155 : vector<4x128xf32>
    %cst_85 = arith.constant 0.000000e+00 : f32
    %157 = vector.broadcast %cst_85 : f32 to vector<4x128xf32>
    %158 = arith.cmpf ogt, %156, %157 : vector<4x128xf32>
    %cst_86 = arith.constant 0.000000e+00 : f32
    %159 = vector.broadcast %cst_86 : f32 to vector<4x128xf32>
    %160 = arith.minimumf %156, %159 : vector<4x128xf32>
    %161 = math.exp %160 : vector<4x128xf32>
    %cst_87 = arith.constant 1.000000e+00 : f32
    %162 = vector.broadcast %cst_87 : f32 to vector<4x128xf32>
    %163 = arith.subf %161, %162 : vector<4x128xf32>
    %164 = arith.select %158, %156, %163 : vector<4x128xi1>, vector<4x128xf32>
    %c0_88 = arith.constant 0 : index
    %c0_89 = arith.constant 0 : index
    %165 = vector.load %arg16[%c0_88, %c0_89] : memref<8x1xf32, #tpu.memory_space<vmem>>, vector<8x1xf32>
    %166 = vector.extract_strided_slice %164 {offsets = [0, 1], sizes = [4, 1], strides = [1, 1]} : vector<4x128xf32> to vector<4x1xf32>
    %167 = tpu.concatenate %166, %164 in 1 : vector<4x1xf32>, vector<4x128xf32> -> vector<4x129xf32>
    %168 = vector.extract_strided_slice %167 {offsets = [0, 0], sizes = [4, 128], strides = [1, 1]} : vector<4x129xf32> to vector<4x128xf32>
    %169 = arith.truncf %168 : vector<4x128xf32> to vector<4x128xbf16>
    %c0_90 = arith.constant 0 : index
    %c0_91 = arith.constant 0 : index
    %c0_92 = arith.constant 0 : index
    %170 = vector.load %arg15[%c0_90, %c0_91, %c0_92] : memref<2x8x4xbf16, #tpu.memory_space<vmem>>, vector<1x8x4xbf16>
    %171 = vector.shape_cast %170 : vector<1x8x4xbf16> to vector<8x4xbf16>
    %cst_93 = arith.constant dense<0.000000e+00> : vector<8x128xf32>
    %172 = tpu.matmul %171, %169, %cst_93 {dimension_numbers = #tpu.dot_dimension_numbers<[1], [0], [0], [1], [0, 0, 1, 1], [], []>} : vector<8x4xbf16>, vector<4x128xbf16>, vector<8x128xf32> -> vector<8x128xf32>
    %173 = vector.extract_strided_slice %167 {offsets = [0, 1], sizes = [4, 128], strides = [1, 1]} : vector<4x129xf32> to vector<4x128xf32>
    %174 = arith.truncf %173 : vector<4x128xf32> to vector<4x128xbf16>
    %c1_94 = arith.constant 1 : index
    %c0_95 = arith.constant 0 : index
    %c0_96 = arith.constant 0 : index
    %175 = vector.load %arg15[%c1_94, %c0_95, %c0_96] : memref<2x8x4xbf16, #tpu.memory_space<vmem>>, vector<1x8x4xbf16>
    %176 = vector.shape_cast %175 : vector<1x8x4xbf16> to vector<8x4xbf16>
    %cst_97 = arith.constant dense<0.000000e+00> : vector<8x128xf32>
    %177 = tpu.matmul %176, %174, %cst_97 {dimension_numbers = #tpu.dot_dimension_numbers<[1], [0], [0], [1], [0, 0, 1, 1], [], []>} : vector<8x4xbf16>, vector<4x128xbf16>, vector<8x128xf32> -> vector<8x128xf32>
    %178 = arith.addf %172, %177 : vector<8x128xf32>
    %179 = vector.broadcast %165 : vector<8x1xf32> to vector<8x128xf32>
    %180 = arith.addf %178, %179 : vector<8x128xf32>
    %cst_98 = arith.constant 0.000000e+00 : f32
    %181 = vector.broadcast %cst_98 : f32 to vector<8x128xf32>
    %182 = arith.cmpf ogt, %180, %181 : vector<8x128xf32>
    %cst_99 = arith.constant 0.000000e+00 : f32
    %183 = vector.broadcast %cst_99 : f32 to vector<8x128xf32>
    %184 = arith.minimumf %180, %183 : vector<8x128xf32>
    %185 = math.exp %184 : vector<8x128xf32>
    %cst_100 = arith.constant 1.000000e+00 : f32
    %186 = vector.broadcast %cst_100 : f32 to vector<8x128xf32>
    %187 = arith.subf %185, %186 : vector<8x128xf32>
    %188 = arith.select %182, %180, %187 : vector<8x128xi1>, vector<8x128xf32>
    %c0_101 = arith.constant 0 : index
    %c0_102 = arith.constant 0 : index
    %189 = vector.load %arg18[%c0_101, %c0_102] : memref<4x1xf32, #tpu.memory_space<vmem>>, vector<4x1xf32>
    %190 = vector.extract_strided_slice %188 {offsets = [0, 1], sizes = [8, 1], strides = [1, 1]} : vector<8x128xf32> to vector<8x1xf32>
    %191 = vector.extract_strided_slice %188 {offsets = [0, 126], sizes = [8, 1], strides = [1, 1]} : vector<8x128xf32> to vector<8x1xf32>
    %192 = tpu.concatenate %190, %188, %191 in 1 : vector<8x1xf32>, vector<8x128xf32>, vector<8x1xf32> -> vector<8x130xf32>
    %193 = vector.extract_strided_slice %192 {offsets = [0, 0], sizes = [8, 128], strides = [1, 1]} : vector<8x130xf32> to vector<8x128xf32>
    %194 = arith.truncf %193 : vector<8x128xf32> to vector<8x128xbf16>
    %c0_103 = arith.constant 0 : index
    %c0_104 = arith.constant 0 : index
    %c0_105 = arith.constant 0 : index
    %195 = vector.load %arg17[%c0_103, %c0_104, %c0_105] : memref<3x4x8xbf16, #tpu.memory_space<vmem>>, vector<1x4x8xbf16>
    %196 = vector.shape_cast %195 : vector<1x4x8xbf16> to vector<4x8xbf16>
    %cst_106 = arith.constant dense<0.000000e+00> : vector<4x128xf32>
    %197 = tpu.matmul %196, %194, %cst_106 {dimension_numbers = #tpu.dot_dimension_numbers<[1], [0], [0], [1], [0, 0, 1, 1], [], []>} : vector<4x8xbf16>, vector<8x128xbf16>, vector<4x128xf32> -> vector<4x128xf32>
    %198 = vector.extract_strided_slice %192 {offsets = [0, 1], sizes = [8, 128], strides = [1, 1]} : vector<8x130xf32> to vector<8x128xf32>
    %199 = arith.truncf %198 : vector<8x128xf32> to vector<8x128xbf16>
    %c1_107 = arith.constant 1 : index
    %c0_108 = arith.constant 0 : index
    %c0_109 = arith.constant 0 : index
    %200 = vector.load %arg17[%c1_107, %c0_108, %c0_109] : memref<3x4x8xbf16, #tpu.memory_space<vmem>>, vector<1x4x8xbf16>
    %201 = vector.shape_cast %200 : vector<1x4x8xbf16> to vector<4x8xbf16>
    %cst_110 = arith.constant dense<0.000000e+00> : vector<4x128xf32>
    %202 = tpu.matmul %201, %199, %cst_110 {dimension_numbers = #tpu.dot_dimension_numbers<[1], [0], [0], [1], [0, 0, 1, 1], [], []>} : vector<4x8xbf16>, vector<8x128xbf16>, vector<4x128xf32> -> vector<4x128xf32>
    %203 = arith.addf %197, %202 : vector<4x128xf32>
    %204 = vector.extract_strided_slice %192 {offsets = [0, 2], sizes = [8, 128], strides = [1, 1]} : vector<8x130xf32> to vector<8x128xf32>
    %205 = arith.truncf %204 : vector<8x128xf32> to vector<8x128xbf16>
    %c2_111 = arith.constant 2 : index
    %c0_112 = arith.constant 0 : index
    %c0_113 = arith.constant 0 : index
    %206 = vector.load %arg17[%c2_111, %c0_112, %c0_113] : memref<3x4x8xbf16, #tpu.memory_space<vmem>>, vector<1x4x8xbf16>
    %207 = vector.shape_cast %206 : vector<1x4x8xbf16> to vector<4x8xbf16>
    %cst_114 = arith.constant dense<0.000000e+00> : vector<4x128xf32>
    %208 = tpu.matmul %207, %205, %cst_114 {dimension_numbers = #tpu.dot_dimension_numbers<[1], [0], [0], [1], [0, 0, 1, 1], [], []>} : vector<4x8xbf16>, vector<8x128xbf16>, vector<4x128xf32> -> vector<4x128xf32>
    %209 = arith.addf %203, %208 : vector<4x128xf32>
    %210 = vector.broadcast %189 : vector<4x1xf32> to vector<4x128xf32>
    %211 = arith.addf %209, %210 : vector<4x128xf32>
    %cst_115 = arith.constant 0.000000e+00 : f32
    %212 = vector.broadcast %cst_115 : f32 to vector<4x128xf32>
    %213 = arith.cmpf ogt, %211, %212 : vector<4x128xf32>
    %cst_116 = arith.constant 0.000000e+00 : f32
    %214 = vector.broadcast %cst_116 : f32 to vector<4x128xf32>
    %215 = arith.minimumf %211, %214 : vector<4x128xf32>
    %216 = math.exp %215 : vector<4x128xf32>
    %cst_117 = arith.constant 1.000000e+00 : f32
    %217 = vector.broadcast %cst_117 : f32 to vector<4x128xf32>
    %218 = arith.subf %216, %217 : vector<4x128xf32>
    %219 = arith.select %213, %211, %218 : vector<4x128xi1>, vector<4x128xf32>
    %c0_118 = arith.constant 0 : index
    %c0_119 = arith.constant 0 : index
    %220 = vector.load %arg20[%c0_118, %c0_119] : memref<8x1xf32, #tpu.memory_space<vmem>>, vector<8x1xf32>
    %c0_120 = arith.constant 0 : index
    %c0_121 = arith.constant 0 : index
    %c0_122 = arith.constant 0 : index
    %221 = vector.load %arg19[%c0_120, %c0_121, %c0_122] : memref<1x8x4xbf16, #tpu.memory_space<vmem>>, vector<1x8x4xbf16>
    %222 = vector.shape_cast %221 : vector<1x8x4xbf16> to vector<8x4xbf16>
    %223 = arith.truncf %219 : vector<4x128xf32> to vector<4x128xbf16>
    %cst_123 = arith.constant dense<0.000000e+00> : vector<8x128xf32>
    %224 = tpu.matmul %222, %223, %cst_123 {dimension_numbers = #tpu.dot_dimension_numbers<[1], [0], [0], [1], [0, 0, 1, 1], [], []>} : vector<8x4xbf16>, vector<4x128xbf16>, vector<8x128xf32> -> vector<8x128xf32>
    %225 = vector.broadcast %220 : vector<8x1xf32> to vector<8x128xf32>
    %226 = arith.addf %224, %225 : vector<8x128xf32>
    %227 = arith.addf %180, %226 : vector<8x128xf32>
    %cst_124 = arith.constant 0.000000e+00 : f32
    %228 = vector.broadcast %cst_124 : f32 to vector<8x128xf32>
    %229 = arith.cmpf ogt, %227, %228 : vector<8x128xf32>
    %cst_125 = arith.constant 0.000000e+00 : f32
    %230 = vector.broadcast %cst_125 : f32 to vector<8x128xf32>
    %231 = arith.minimumf %227, %230 : vector<8x128xf32>
    %232 = math.exp %231 : vector<8x128xf32>
    %cst_126 = arith.constant 1.000000e+00 : f32
    %233 = vector.broadcast %cst_126 : f32 to vector<8x128xf32>
    %234 = arith.subf %232, %233 : vector<8x128xf32>
    %235 = arith.select %229, %227, %234 : vector<8x128xi1>, vector<8x128xf32>
    %c0_127 = arith.constant 0 : index
    %c0_128 = arith.constant 0 : index
    %236 = vector.load %arg22[%c0_127, %c0_128] : memref<4x1xf32, #tpu.memory_space<vmem>>, vector<4x1xf32>
    %237 = vector.extract_strided_slice %235 {offsets = [0, 2], sizes = [8, 1], strides = [1, 1]} : vector<8x128xf32> to vector<8x1xf32>
    %238 = vector.extract_strided_slice %235 {offsets = [0, 1], sizes = [8, 1], strides = [1, 1]} : vector<8x128xf32> to vector<8x1xf32>
    %239 = vector.extract_strided_slice %235 {offsets = [0, 126], sizes = [8, 1], strides = [1, 1]} : vector<8x128xf32> to vector<8x1xf32>
    %240 = vector.extract_strided_slice %235 {offsets = [0, 125], sizes = [8, 1], strides = [1, 1]} : vector<8x128xf32> to vector<8x1xf32>
    %241 = tpu.concatenate %237, %238, %235, %239, %240 in 1 : vector<8x1xf32>, vector<8x1xf32>, vector<8x128xf32>, vector<8x1xf32>, vector<8x1xf32> -> vector<8x132xf32>
    %242 = vector.extract_strided_slice %241 {offsets = [0, 0], sizes = [8, 128], strides = [1, 1]} : vector<8x132xf32> to vector<8x128xf32>
    %243 = arith.truncf %242 : vector<8x128xf32> to vector<8x128xbf16>
    %c0_129 = arith.constant 0 : index
    %c0_130 = arith.constant 0 : index
    %c0_131 = arith.constant 0 : index
    %244 = vector.load %arg21[%c0_129, %c0_130, %c0_131] : memref<3x4x8xbf16, #tpu.memory_space<vmem>>, vector<1x4x8xbf16>
    %245 = vector.shape_cast %244 : vector<1x4x8xbf16> to vector<4x8xbf16>
    %cst_132 = arith.constant dense<0.000000e+00> : vector<4x128xf32>
    %246 = tpu.matmul %245, %243, %cst_132 {dimension_numbers = #tpu.dot_dimension_numbers<[1], [0], [0], [1], [0, 0, 1, 1], [], []>} : vector<4x8xbf16>, vector<8x128xbf16>, vector<4x128xf32> -> vector<4x128xf32>
    %247 = vector.extract_strided_slice %241 {offsets = [0, 2], sizes = [8, 128], strides = [1, 1]} : vector<8x132xf32> to vector<8x128xf32>
    %248 = arith.truncf %247 : vector<8x128xf32> to vector<8x128xbf16>
    %c1_133 = arith.constant 1 : index
    %c0_134 = arith.constant 0 : index
    %c0_135 = arith.constant 0 : index
    %249 = vector.load %arg21[%c1_133, %c0_134, %c0_135] : memref<3x4x8xbf16, #tpu.memory_space<vmem>>, vector<1x4x8xbf16>
    %250 = vector.shape_cast %249 : vector<1x4x8xbf16> to vector<4x8xbf16>
    %cst_136 = arith.constant dense<0.000000e+00> : vector<4x128xf32>
    %251 = tpu.matmul %250, %248, %cst_136 {dimension_numbers = #tpu.dot_dimension_numbers<[1], [0], [0], [1], [0, 0, 1, 1], [], []>} : vector<4x8xbf16>, vector<8x128xbf16>, vector<4x128xf32> -> vector<4x128xf32>
    %252 = arith.addf %246, %251 : vector<4x128xf32>
    %253 = vector.extract_strided_slice %241 {offsets = [0, 4], sizes = [8, 128], strides = [1, 1]} : vector<8x132xf32> to vector<8x128xf32>
    %254 = arith.truncf %253 : vector<8x128xf32> to vector<8x128xbf16>
    %c2_137 = arith.constant 2 : index
    %c0_138 = arith.constant 0 : index
    %c0_139 = arith.constant 0 : index
    %255 = vector.load %arg21[%c2_137, %c0_138, %c0_139] : memref<3x4x8xbf16, #tpu.memory_space<vmem>>, vector<1x4x8xbf16>
    %256 = vector.shape_cast %255 : vector<1x4x8xbf16> to vector<4x8xbf16>
    %cst_140 = arith.constant dense<0.000000e+00> : vector<4x128xf32>
    %257 = tpu.matmul %256, %254, %cst_140 {dimension_numbers = #tpu.dot_dimension_numbers<[1], [0], [0], [1], [0, 0, 1, 1], [], []>} : vector<4x8xbf16>, vector<8x128xbf16>, vector<4x128xf32> -> vector<4x128xf32>
    %258 = arith.addf %252, %257 : vector<4x128xf32>
    %259 = vector.broadcast %236 : vector<4x1xf32> to vector<4x128xf32>
    %260 = arith.addf %258, %259 : vector<4x128xf32>
    %cst_141 = arith.constant 0.000000e+00 : f32
    %261 = vector.broadcast %cst_141 : f32 to vector<4x128xf32>
    %262 = arith.cmpf ogt, %260, %261 : vector<4x128xf32>
    %cst_142 = arith.constant 0.000000e+00 : f32
    %263 = vector.broadcast %cst_142 : f32 to vector<4x128xf32>
    %264 = arith.minimumf %260, %263 : vector<4x128xf32>
    %265 = math.exp %264 : vector<4x128xf32>
    %cst_143 = arith.constant 1.000000e+00 : f32
    %266 = vector.broadcast %cst_143 : f32 to vector<4x128xf32>
    %267 = arith.subf %265, %266 : vector<4x128xf32>
    %268 = arith.select %262, %260, %267 : vector<4x128xi1>, vector<4x128xf32>
    %c0_144 = arith.constant 0 : index
    %c0_145 = arith.constant 0 : index
    %269 = vector.load %arg24[%c0_144, %c0_145] : memref<8x1xf32, #tpu.memory_space<vmem>>, vector<8x1xf32>
    %c0_146 = arith.constant 0 : index
    %c0_147 = arith.constant 0 : index
    %c0_148 = arith.constant 0 : index
    %270 = vector.load %arg23[%c0_146, %c0_147, %c0_148] : memref<1x8x4xbf16, #tpu.memory_space<vmem>>, vector<1x8x4xbf16>
    %271 = vector.shape_cast %270 : vector<1x8x4xbf16> to vector<8x4xbf16>
    %272 = arith.truncf %268 : vector<4x128xf32> to vector<4x128xbf16>
    %cst_149 = arith.constant dense<0.000000e+00> : vector<8x128xf32>
    %273 = tpu.matmul %271, %272, %cst_149 {dimension_numbers = #tpu.dot_dimension_numbers<[1], [0], [0], [1], [0, 0, 1, 1], [], []>} : vector<8x4xbf16>, vector<4x128xbf16>, vector<8x128xf32> -> vector<8x128xf32>
    %274 = vector.broadcast %269 : vector<8x1xf32> to vector<8x128xf32>
    %275 = arith.addf %273, %274 : vector<8x128xf32>
    %276 = arith.addf %227, %275 : vector<8x128xf32>
    %cst_150 = arith.constant 0.000000e+00 : f32
    %277 = vector.broadcast %cst_150 : f32 to vector<8x128xf32>
    %278 = arith.cmpf ogt, %276, %277 : vector<8x128xf32>
    %cst_151 = arith.constant 0.000000e+00 : f32
    %279 = vector.broadcast %cst_151 : f32 to vector<8x128xf32>
    %280 = arith.minimumf %276, %279 : vector<8x128xf32>
    %281 = math.exp %280 : vector<8x128xf32>
    %cst_152 = arith.constant 1.000000e+00 : f32
    %282 = vector.broadcast %cst_152 : f32 to vector<8x128xf32>
    %283 = arith.subf %281, %282 : vector<8x128xf32>
    %284 = arith.select %278, %276, %283 : vector<8x128xi1>, vector<8x128xf32>
    %c0_153 = arith.constant 0 : index
    %c0_154 = arith.constant 0 : index
    %285 = vector.load %arg26[%c0_153, %c0_154] : memref<16x1xf32, #tpu.memory_space<vmem>>, vector<16x1xf32>
    %286 = vector.extract_strided_slice %284 {offsets = [0, 1], sizes = [8, 1], strides = [1, 1]} : vector<8x128xf32> to vector<8x1xf32>
    %287 = tpu.concatenate %286, %284 in 1 : vector<8x1xf32>, vector<8x128xf32> -> vector<8x129xf32>
    %288 = vector.extract_strided_slice %287 {offsets = [0, 0], sizes = [8, 128], strides = [1, 1]} : vector<8x129xf32> to vector<8x128xf32>
    %289 = arith.truncf %288 : vector<8x128xf32> to vector<8x128xbf16>
    %c0_155 = arith.constant 0 : index
    %c0_156 = arith.constant 0 : index
    %c0_157 = arith.constant 0 : index
    %290 = vector.load %arg25[%c0_155, %c0_156, %c0_157] : memref<2x16x8xbf16, #tpu.memory_space<vmem>>, vector<1x16x8xbf16>
    %291 = vector.shape_cast %290 : vector<1x16x8xbf16> to vector<16x8xbf16>
    %cst_158 = arith.constant dense<0.000000e+00> : vector<16x128xf32>
    %292 = tpu.matmul %291, %289, %cst_158 {dimension_numbers = #tpu.dot_dimension_numbers<[1], [0], [0], [1], [0, 0, 1, 1], [], []>} : vector<16x8xbf16>, vector<8x128xbf16>, vector<16x128xf32> -> vector<16x128xf32>
    %293 = vector.extract_strided_slice %287 {offsets = [0, 1], sizes = [8, 128], strides = [1, 1]} : vector<8x129xf32> to vector<8x128xf32>
    %294 = arith.truncf %293 : vector<8x128xf32> to vector<8x128xbf16>
    %c1_159 = arith.constant 1 : index
    %c0_160 = arith.constant 0 : index
    %c0_161 = arith.constant 0 : index
    %295 = vector.load %arg25[%c1_159, %c0_160, %c0_161] : memref<2x16x8xbf16, #tpu.memory_space<vmem>>, vector<1x16x8xbf16>
    %296 = vector.shape_cast %295 : vector<1x16x8xbf16> to vector<16x8xbf16>
    %cst_162 = arith.constant dense<0.000000e+00> : vector<16x128xf32>
    %297 = tpu.matmul %296, %294, %cst_162 {dimension_numbers = #tpu.dot_dimension_numbers<[1], [0], [0], [1], [0, 0, 1, 1], [], []>} : vector<16x8xbf16>, vector<8x128xbf16>, vector<16x128xf32> -> vector<16x128xf32>
    %298 = arith.addf %292, %297 : vector<16x128xf32>
    %299 = vector.broadcast %285 : vector<16x1xf32> to vector<16x128xf32>
    %300 = arith.addf %298, %299 : vector<16x128xf32>
    %cst_163 = arith.constant 0.000000e+00 : f32
    %301 = vector.broadcast %cst_163 : f32 to vector<16x128xf32>
    %302 = arith.cmpf ogt, %300, %301 : vector<16x128xf32>
    %cst_164 = arith.constant 0.000000e+00 : f32
    %303 = vector.broadcast %cst_164 : f32 to vector<16x128xf32>
    %304 = arith.minimumf %300, %303 : vector<16x128xf32>
    %305 = math.exp %304 : vector<16x128xf32>
    %cst_165 = arith.constant 1.000000e+00 : f32
    %306 = vector.broadcast %cst_165 : f32 to vector<16x128xf32>
    %307 = arith.subf %305, %306 : vector<16x128xf32>
    %308 = arith.select %302, %300, %307 : vector<16x128xi1>, vector<16x128xf32>
    %c0_166 = arith.constant 0 : index
    %c0_167 = arith.constant 0 : index
    %309 = vector.load %arg28[%c0_166, %c0_167] : memref<8x1xf32, #tpu.memory_space<vmem>>, vector<8x1xf32>
    %310 = vector.extract_strided_slice %308 {offsets = [0, 3], sizes = [16, 1], strides = [1, 1]} : vector<16x128xf32> to vector<16x1xf32>
    %311 = vector.extract_strided_slice %308 {offsets = [0, 2], sizes = [16, 1], strides = [1, 1]} : vector<16x128xf32> to vector<16x1xf32>
    %312 = vector.extract_strided_slice %308 {offsets = [0, 1], sizes = [16, 1], strides = [1, 1]} : vector<16x128xf32> to vector<16x1xf32>
    %313 = vector.extract_strided_slice %308 {offsets = [0, 126], sizes = [16, 1], strides = [1, 1]} : vector<16x128xf32> to vector<16x1xf32>
    %314 = vector.extract_strided_slice %308 {offsets = [0, 125], sizes = [16, 1], strides = [1, 1]} : vector<16x128xf32> to vector<16x1xf32>
    %315 = vector.extract_strided_slice %308 {offsets = [0, 124], sizes = [16, 1], strides = [1, 1]} : vector<16x128xf32> to vector<16x1xf32>
    %316 = tpu.concatenate %310, %311, %312, %308, %313, %314, %315 in 1 : vector<16x1xf32>, vector<16x1xf32>, vector<16x1xf32>, vector<16x128xf32>, vector<16x1xf32>, vector<16x1xf32>, vector<16x1xf32> -> vector<16x134xf32>
    %317 = vector.extract_strided_slice %316 {offsets = [0, 0], sizes = [16, 128], strides = [1, 1]} : vector<16x134xf32> to vector<16x128xf32>
    %318 = arith.truncf %317 : vector<16x128xf32> to vector<16x128xbf16>
    %c0_168 = arith.constant 0 : index
    %c0_169 = arith.constant 0 : index
    %c0_170 = arith.constant 0 : index
    %319 = vector.load %arg27[%c0_168, %c0_169, %c0_170] : memref<7x8x16xbf16, #tpu.memory_space<vmem>>, vector<1x8x16xbf16>
    %320 = vector.shape_cast %319 : vector<1x8x16xbf16> to vector<8x16xbf16>
    %cst_171 = arith.constant dense<0.000000e+00> : vector<8x128xf32>
    %321 = tpu.matmul %320, %318, %cst_171 {dimension_numbers = #tpu.dot_dimension_numbers<[1], [0], [0], [1], [0, 0, 1, 1], [], []>} : vector<8x16xbf16>, vector<16x128xbf16>, vector<8x128xf32> -> vector<8x128xf32>
    %322 = vector.extract_strided_slice %316 {offsets = [0, 1], sizes = [16, 128], strides = [1, 1]} : vector<16x134xf32> to vector<16x128xf32>
    %323 = arith.truncf %322 : vector<16x128xf32> to vector<16x128xbf16>
    %c1_172 = arith.constant 1 : index
    %c0_173 = arith.constant 0 : index
    %c0_174 = arith.constant 0 : index
    %324 = vector.load %arg27[%c1_172, %c0_173, %c0_174] : memref<7x8x16xbf16, #tpu.memory_space<vmem>>, vector<1x8x16xbf16>
    %325 = vector.shape_cast %324 : vector<1x8x16xbf16> to vector<8x16xbf16>
    %cst_175 = arith.constant dense<0.000000e+00> : vector<8x128xf32>
    %326 = tpu.matmul %325, %323, %cst_175 {dimension_numbers = #tpu.dot_dimension_numbers<[1], [0], [0], [1], [0, 0, 1, 1], [], []>} : vector<8x16xbf16>, vector<16x128xbf16>, vector<8x128xf32> -> vector<8x128xf32>
    %327 = arith.addf %321, %326 : vector<8x128xf32>
    %328 = vector.extract_strided_slice %316 {offsets = [0, 2], sizes = [16, 128], strides = [1, 1]} : vector<16x134xf32> to vector<16x128xf32>
    %329 = arith.truncf %328 : vector<16x128xf32> to vector<16x128xbf16>
    %c2_176 = arith.constant 2 : index
    %c0_177 = arith.constant 0 : index
    %c0_178 = arith.constant 0 : index
    %330 = vector.load %arg27[%c2_176, %c0_177, %c0_178] : memref<7x8x16xbf16, #tpu.memory_space<vmem>>, vector<1x8x16xbf16>
    %331 = vector.shape_cast %330 : vector<1x8x16xbf16> to vector<8x16xbf16>
    %cst_179 = arith.constant dense<0.000000e+00> : vector<8x128xf32>
    %332 = tpu.matmul %331, %329, %cst_179 {dimension_numbers = #tpu.dot_dimension_numbers<[1], [0], [0], [1], [0, 0, 1, 1], [], []>} : vector<8x16xbf16>, vector<16x128xbf16>, vector<8x128xf32> -> vector<8x128xf32>
    %333 = arith.addf %327, %332 : vector<8x128xf32>
    %334 = vector.extract_strided_slice %316 {offsets = [0, 3], sizes = [16, 128], strides = [1, 1]} : vector<16x134xf32> to vector<16x128xf32>
    %335 = arith.truncf %334 : vector<16x128xf32> to vector<16x128xbf16>
    %c3_180 = arith.constant 3 : index
    %c0_181 = arith.constant 0 : index
    %c0_182 = arith.constant 0 : index
    %336 = vector.load %arg27[%c3_180, %c0_181, %c0_182] : memref<7x8x16xbf16, #tpu.memory_space<vmem>>, vector<1x8x16xbf16>
    %337 = vector.shape_cast %336 : vector<1x8x16xbf16> to vector<8x16xbf16>
    %cst_183 = arith.constant dense<0.000000e+00> : vector<8x128xf32>
    %338 = tpu.matmul %337, %335, %cst_183 {dimension_numbers = #tpu.dot_dimension_numbers<[1], [0], [0], [1], [0, 0, 1, 1], [], []>} : vector<8x16xbf16>, vector<16x128xbf16>, vector<8x128xf32> -> vector<8x128xf32>
    %339 = arith.addf %333, %338 : vector<8x128xf32>
    %340 = vector.extract_strided_slice %316 {offsets = [0, 4], sizes = [16, 128], strides = [1, 1]} : vector<16x134xf32> to vector<16x128xf32>
    %341 = arith.truncf %340 : vector<16x128xf32> to vector<16x128xbf16>
    %c4_184 = arith.constant 4 : index
    %c0_185 = arith.constant 0 : index
    %c0_186 = arith.constant 0 : index
    %342 = vector.load %arg27[%c4_184, %c0_185, %c0_186] : memref<7x8x16xbf16, #tpu.memory_space<vmem>>, vector<1x8x16xbf16>
    %343 = vector.shape_cast %342 : vector<1x8x16xbf16> to vector<8x16xbf16>
    %cst_187 = arith.constant dense<0.000000e+00> : vector<8x128xf32>
    %344 = tpu.matmul %343, %341, %cst_187 {dimension_numbers = #tpu.dot_dimension_numbers<[1], [0], [0], [1], [0, 0, 1, 1], [], []>} : vector<8x16xbf16>, vector<16x128xbf16>, vector<8x128xf32> -> vector<8x128xf32>
    %345 = arith.addf %339, %344 : vector<8x128xf32>
    %346 = vector.extract_strided_slice %316 {offsets = [0, 5], sizes = [16, 128], strides = [1, 1]} : vector<16x134xf32> to vector<16x128xf32>
    %347 = arith.truncf %346 : vector<16x128xf32> to vector<16x128xbf16>
    %c5_188 = arith.constant 5 : index
    %c0_189 = arith.constant 0 : index
    %c0_190 = arith.constant 0 : index
    %348 = vector.load %arg27[%c5_188, %c0_189, %c0_190] : memref<7x8x16xbf16, #tpu.memory_space<vmem>>, vector<1x8x16xbf16>
    %349 = vector.shape_cast %348 : vector<1x8x16xbf16> to vector<8x16xbf16>
    %cst_191 = arith.constant dense<0.000000e+00> : vector<8x128xf32>
    %350 = tpu.matmul %349, %347, %cst_191 {dimension_numbers = #tpu.dot_dimension_numbers<[1], [0], [0], [1], [0, 0, 1, 1], [], []>} : vector<8x16xbf16>, vector<16x128xbf16>, vector<8x128xf32> -> vector<8x128xf32>
    %351 = arith.addf %345, %350 : vector<8x128xf32>
    %352 = vector.extract_strided_slice %316 {offsets = [0, 6], sizes = [16, 128], strides = [1, 1]} : vector<16x134xf32> to vector<16x128xf32>
    %353 = arith.truncf %352 : vector<16x128xf32> to vector<16x128xbf16>
    %c6_192 = arith.constant 6 : index
    %c0_193 = arith.constant 0 : index
    %c0_194 = arith.constant 0 : index
    %354 = vector.load %arg27[%c6_192, %c0_193, %c0_194] : memref<7x8x16xbf16, #tpu.memory_space<vmem>>, vector<1x8x16xbf16>
    %355 = vector.shape_cast %354 : vector<1x8x16xbf16> to vector<8x16xbf16>
    %cst_195 = arith.constant dense<0.000000e+00> : vector<8x128xf32>
    %356 = tpu.matmul %355, %353, %cst_195 {dimension_numbers = #tpu.dot_dimension_numbers<[1], [0], [0], [1], [0, 0, 1, 1], [], []>} : vector<8x16xbf16>, vector<16x128xbf16>, vector<8x128xf32> -> vector<8x128xf32>
    %357 = arith.addf %351, %356 : vector<8x128xf32>
    %358 = vector.broadcast %309 : vector<8x1xf32> to vector<8x128xf32>
    %359 = arith.addf %357, %358 : vector<8x128xf32>
    %c0_196 = arith.constant 0 : index
    %c0_197 = arith.constant 0 : index
    %c0_198 = arith.constant 0 : index
    %360 = vector.load %arg29[%c0_196, %c0_197, %c0_198] : memref<1x8x128xf32, #tpu.memory_space<vmem>>, vector<1x8x128xf32>
    %361 = vector.shape_cast %360 : vector<1x8x128xf32> to vector<8x128xf32>
    %362 = vector.shape_cast %359 : vector<8x128xf32> to vector<1x8x128xf32>
    tpu.vector_store %arg29[%c0_196, %c0_197, %c0_198], %362 {strides = array<i32>} : memref<1x8x128xf32, #tpu.memory_space<vmem>>, vector<1x8x128xf32>,
    return
  }
  func.func @transform_0(%arg0: i32) -> (i32, i32, i32) {
    %c0_i32 = arith.constant 0 : i32
    %c0_i32_0 = arith.constant 0 : i32
    %c0_i32_1 = arith.constant 0 : i32
    return %arg0, %c0_i32, %c0_i32_0 : i32, i32, i32
  }
  func.func @transform_1(%arg0: i32) -> (i32, i32, i32) {
    %c0_i32 = arith.constant 0 : i32
    %c0_i32_0 = arith.constant 0 : i32
    %c0_i32_1 = arith.constant 0 : i32
    return %arg0, %c0_i32, %c0_i32_0 : i32, i32, i32
  }
  func.func @transform_2(%arg0: i32) -> (i32, i32) {
    %c0_i32 = arith.constant 0 : i32
    %c0_i32_0 = arith.constant 0 : i32
    %c0_i32_1 = arith.constant 0 : i32
    return %c0_i32, %c0_i32_0 : i32, i32
  }
  func.func @transform_3(%arg0: i32) -> (i32, i32) {
    %c0_i32 = arith.constant 0 : i32
    %c0_i32_0 = arith.constant 0 : i32
    %c0_i32_1 = arith.constant 0 : i32
    return %c0_i32, %c0_i32_0 : i32, i32
  }
  func.func @transform_4(%arg0: i32) -> (i32, i32, i32) {
    %c0_i32 = arith.constant 0 : i32
    %c0_i32_0 = arith.constant 0 : i32
    %c0_i32_1 = arith.constant 0 : i32
    %c0_i32_2 = arith.constant 0 : i32
    return %c0_i32, %c0_i32_0, %c0_i32_1 : i32, i32, i32
  }
  func.func @transform_5(%arg0: i32) -> (i32, i32) {
    %c0_i32 = arith.constant 0 : i32
    %c0_i32_0 = arith.constant 0 : i32
    %c0_i32_1 = arith.constant 0 : i32
    return %c0_i32, %c0_i32_0 : i32, i32
  }
  func.func @transform_6(%arg0: i32) -> (i32, i32, i32) {
    %c0_i32 = arith.constant 0 : i32
    %c0_i32_0 = arith.constant 0 : i32
    %c0_i32_1 = arith.constant 0 : i32
    %c0_i32_2 = arith.constant 0 : i32
    return %c0_i32, %c0_i32_0, %c0_i32_1 : i32, i32, i32
  }
  func.func @transform_7(%arg0: i32) -> (i32, i32) {
    %c0_i32 = arith.constant 0 : i32
    %c0_i32_0 = arith.constant 0 : i32
    %c0_i32_1 = arith.constant 0 : i32
    return %c0_i32, %c0_i32_0 : i32, i32
  }
  func.func @transform_8(%arg0: i32) -> (i32, i32, i32) {
    %c0_i32 = arith.constant 0 : i32
    %c0_i32_0 = arith.constant 0 : i32
    %c0_i32_1 = arith.constant 0 : i32
    %c0_i32_2 = arith.constant 0 : i32
    return %c0_i32, %c0_i32_0, %c0_i32_1 : i32, i32, i32
  }
  func.func @transform_9(%arg0: i32) -> (i32, i32) {
    %c0_i32 = arith.constant 0 : i32
    %c0_i32_0 = arith.constant 0 : i32
    %c0_i32_1 = arith.constant 0 : i32
    return %c0_i32, %c0_i32_0 : i32, i32
  }
  func.func @transform_10(%arg0: i32) -> (i32, i32, i32) {
    %c0_i32 = arith.constant 0 : i32
    %c0_i32_0 = arith.constant 0 : i32
    %c0_i32_1 = arith.constant 0 : i32
    %c0_i32_2 = arith.constant 0 : i32
    return %c0_i32, %c0_i32_0, %c0_i32_1 : i32, i32, i32
  }
  func.func @transform_11(%arg0: i32) -> (i32, i32) {
    %c0_i32 = arith.constant 0 : i32
    %c0_i32_0 = arith.constant 0 : i32
    %c0_i32_1 = arith.constant 0 : i32
    return %c0_i32, %c0_i32_0 : i32, i32
  }
  func.func @transform_12(%arg0: i32) -> (i32, i32, i32) {
    %c0_i32 = arith.constant 0 : i32
    %c0_i32_0 = arith.constant 0 : i32
    %c0_i32_1 = arith.constant 0 : i32
    %c0_i32_2 = arith.constant 0 : i32
    return %c0_i32, %c0_i32_0, %c0_i32_1 : i32, i32, i32
  }
  func.func @transform_13(%arg0: i32) -> (i32, i32) {
    %c0_i32 = arith.constant 0 : i32
    %c0_i32_0 = arith.constant 0 : i32
    %c0_i32_1 = arith.constant 0 : i32
    return %c0_i32, %c0_i32_0 : i32, i32
  }
  func.func @transform_14(%arg0: i32) -> (i32, i32, i32) {
    %c0_i32 = arith.constant 0 : i32
    %c0_i32_0 = arith.constant 0 : i32
    %c0_i32_1 = arith.constant 0 : i32
    %c0_i32_2 = arith.constant 0 : i32
    return %c0_i32, %c0_i32_0, %c0_i32_1 : i32, i32, i32
  }
  func.func @transform_15(%arg0: i32) -> (i32, i32) {
    %c0_i32 = arith.constant 0 : i32
    %c0_i32_0 = arith.constant 0 : i32
    %c0_i32_1 = arith.constant 0 : i32
    return %c0_i32, %c0_i32_0 : i32, i32
  }
  func.func @transform_16(%arg0: i32) -> (i32, i32, i32) {
    %c0_i32 = arith.constant 0 : i32
    %c0_i32_0 = arith.constant 0 : i32
    %c0_i32_1 = arith.constant 0 : i32
    %c0_i32_2 = arith.constant 0 : i32
    return %c0_i32, %c0_i32_0, %c0_i32_1 : i32, i32, i32
  }
  func.func @transform_17(%arg0: i32) -> (i32, i32) {
    %c0_i32 = arith.constant 0 : i32
    %c0_i32_0 = arith.constant 0 : i32
    %c0_i32_1 = arith.constant 0 : i32
    return %c0_i32, %c0_i32_0 : i32, i32
  }
  func.func @transform_18(%arg0: i32) -> (i32, i32, i32) {
    %c0_i32 = arith.constant 0 : i32
    %c0_i32_0 = arith.constant 0 : i32
    %c0_i32_1 = arith.constant 0 : i32
    %c0_i32_2 = arith.constant 0 : i32
    return %c0_i32, %c0_i32_0, %c0_i32_1 : i32, i32, i32
  }
  func.func @transform_19(%arg0: i32) -> (i32, i32) {
    %c0_i32 = arith.constant 0 : i32
    %c0_i32_0 = arith.constant 0 : i32
    %c0_i32_1 = arith.constant 0 : i32
    return %c0_i32, %c0_i32_0 : i32, i32
  }
  func.func @transform_20(%arg0: i32) -> (i32, i32, i32) {
    %c0_i32 = arith.constant 0 : i32
    %c0_i32_0 = arith.constant 0 : i32
    %c0_i32_1 = arith.constant 0 : i32
    %c0_i32_2 = arith.constant 0 : i32
    return %c0_i32, %c0_i32_0, %c0_i32_1 : i32, i32, i32
  }
  func.func @transform_21(%arg0: i32) -> (i32, i32) {
    %c0_i32 = arith.constant 0 : i32
    %c0_i32_0 = arith.constant 0 : i32
    %c0_i32_1 = arith.constant 0 : i32
    return %c0_i32, %c0_i32_0 : i32, i32
  }
  func.func @transform_22(%arg0: i32) -> (i32, i32, i32) {
    %c0_i32 = arith.constant 0 : i32
    %c0_i32_0 = arith.constant 0 : i32
    %c0_i32_1 = arith.constant 0 : i32
    %c0_i32_2 = arith.constant 0 : i32
    return %c0_i32, %c0_i32_0, %c0_i32_1 : i32, i32, i32
  }
  func.func @transform_23(%arg0: i32) -> (i32, i32) {
    %c0_i32 = arith.constant 0 : i32
    %c0_i32_0 = arith.constant 0 : i32
    %c0_i32_1 = arith.constant 0 : i32
    return %c0_i32, %c0_i32_0 : i32, i32
  }
  func.func @transform_24(%arg0: i32) -> (i32, i32, i32) {
    %c0_i32 = arith.constant 0 : i32
    %c0_i32_0 = arith.constant 0 : i32
    %c0_i32_1 = arith.constant 0 : i32
    %c0_i32_2 = arith.constant 0 : i32
    return %c0_i32, %c0_i32_0, %c0_i32_1 : i32, i32, i32
  }
  func.func @transform_25(%arg0: i32) -> (i32, i32) {
    %c0_i32 = arith.constant 0 : i32
    %c0_i32_0 = arith.constant 0 : i32
    %c0_i32_1 = arith.constant 0 : i32
    return %c0_i32, %c0_i32_0 : i32, i32
  }
  func.func @transform_26(%arg0: i32) -> (i32, i32, i32) {
    %c0_i32 = arith.constant 0 : i32
    %c0_i32_0 = arith.constant 0 : i32
    %c0_i32_1 = arith.constant 0 : i32
    %c0_i32_2 = arith.constant 0 : i32
    return %c0_i32, %c0_i32_0, %c0_i32_1 : i32, i32, i32
  }
  func.func @transform_27(%arg0: i32) -> (i32, i32) {
    %c0_i32 = arith.constant 0 : i32
    %c0_i32_0 = arith.constant 0 : i32
    %c0_i32_1 = arith.constant 0 : i32
    return %c0_i32, %c0_i32_0 : i32, i32
  }
  func.func @transform_28(%arg0: i32) -> (i32, i32, i32) {
    %c0_i32 = arith.constant 0 : i32
    %c0_i32_0 = arith.constant 0 : i32
    %c0_i32_1 = arith.constant 0 : i32
    return %arg0, %c0_i32, %c0_i32_0 : i32, i32, i32
  }
}

</mosaic_0001>

<bundles_post_ra>
// kernel: _lambda_.1
= control target key start
LH: loop header
LB: loop body
LE: loop exit
PB: predicated region body
PF: predicated region fallthrough
CT: control target
= control target key end

     0   :  { %s3137_s0 = inlined_call_operand.vmem [shape: f32[2,16,128], index: 0, kind: input, shape index: {}]   ;;  %s3138_s1 = inlined_call_operand.vmem [shape: f32[2,8,128], index: 1, kind: input, shape index: {}]   ;;  %s3139_s2 = inlined_call_operand.vmem [shape: f32[16,8], index: 2, kind: input, shape index: {}]   ;;  %s3140_s3 = inlined_call_operand.vmem [shape: f32[16,1], index: 3, kind: input, shape index: {}]   ;;  %s3141_s4 = inlined_call_operand.vmem [shape: bf16[7,4,16], index: 4, kind: input, shape index: {}]   ;;  %s3142_s5 = inlined_call_operand.vmem [shape: f32[4,1], index: 5, kind: input, shape index: {}]   ;;  %s3143_s6 = inlined_call_operand.vmem [shape: bf16[3,2,4], index: 6, kind: input, shape index: {}]   ;;  %s3144_s7 = inlined_call_operand.vmem [shape: f32[2,1], index: 7, kind: input, shape index: {}]   ;;  %s3145_s8 = inlined_call_operand.vmem [shape: bf16[1,4,2], index: 8, kind: input, shape index: {}]   ;;  %s3146_s9 = inlined_call_operand.vmem [shape: f32[4,1], index: 9, kind: input, shape index: {}]   ;;  %s3147_s10 = inlined_call_operand.vmem [shape: bf16[3,2,4], index: 10, kind: input, shape index: {}]   ;;  %s3148_s11 = inlined_call_operand.vmem [shape: f32[2,1], index: 11, kind: input, shape index: {}]   ;;  %s3149_s12 = inlined_call_operand.vmem [shape: bf16[1,4,2], index: 12, kind: input, shape index: {}]   ;;  %s3150_s13 = inlined_call_operand.vmem [shape: f32[4,1], index: 13, kind: input, shape index: {}]   ;;  %s3151_s14 = inlined_call_operand.vmem [shape: bf16[2,8,4], index: 14, kind: input, shape index: {}]   ;;  %s3152_s15 = inlined_call_operand.vmem [shape: f32[8,1], index: 15, kind: input, shape index: {}]   ;;  %s3153_s16 = inlined_call_operand.vmem [shape: bf16[3,4,8], index: 16, kind: input, shape index: {}]   ;;  %s3154_s17 = inlined_call_operand.vmem [shape: f32[4,1], index: 17, kind: input, shape index: {}]   ;;  %s3155_s18 = inlined_call_operand.vmem [shape: bf16[1,8,4], index: 18, kind: input, shape index: {}]   ;;  %s3156_s19 = inlined_call_operand.vmem [shape: f32[8,1], index: 19, kind: input, shape index: {}]   ;;  %s3157_s20 = inlined_call_operand.vmem [shape: bf16[3,4,8], index: 20, kind: input, shape index: {}]   ;;  %s3158_s21 = inlined_call_operand.vmem [shape: f32[4,1], index: 21, kind: input, shape index: {}]   ;;  %s3159_s22 = inlined_call_operand.vmem [shape: bf16[1,8,4], index: 22, kind: input, shape index: {}]   ;;  %s3160_s23 = inlined_call_operand.vmem [shape: f32[8,1], index: 23, kind: input, shape index: {}]   ;;  %s3161_s24 = inlined_call_operand.vmem [shape: bf16[2,16,8], index: 24, kind: input, shape index: {}]   ;;  %s3162_s25 = inlined_call_operand.vmem [shape: f32[16,1], index: 25, kind: input, shape index: {}]   ;;  %s3163_s26 = inlined_call_operand.vmem [shape: bf16[7,8,16], index: 26, kind: input, shape index: {}]   ;;  %s3164_s27 = inlined_call_operand.vmem [shape: f32[8,1], index: 27, kind: input, shape index: {}]   ;;  %s3165_s28 = inlined_call_operand.hbm [shape: f32[2,8,128], index: 28, kind: output, shape index: {}]  }
   0x1   :  { %3207 = sst [smem:[#allocation13_spill]] %s3137_s0 }
   0x2   :  { %3208 = sst [smem:[#allocation14_spill]] %s3138_s1 }
   0x3   :  { %3209 = sst [smem:[#allocation15_spill]] %s3139_s2 }
   0x4   :  { %3210 = sst [smem:[#allocation16_spill]] %s3140_s3 }
   0x5   :  { %3211 = sst [smem:[#allocation17_spill]] %s3141_s4 }
   0x6   :  { %3212 = sst [smem:[#allocation18_spill]] %s3142_s5 }
   0x7   :  { %3213 = sst [smem:[#allocation19_spill]] %s3143_s6 }
   0x8   :  { %3214 = sst [smem:[#allocation20_spill]] %s3144_s7 }
   0x9   :  { %3215 = sst [smem:[#allocation21_spill]] %s3145_s8 }
   0xa   :  { %3216 = sst [smem:[#allocation22_spill]] %s3146_s9 }
   0xb   :  { %3217 = sst [smem:[#allocation23_spill]] %s3147_s10 }
   0xc   :  { %3218 = sst [smem:[#allocation24_spill]] %s3148_s11 }
   0xd   :  { %3219 = sst [smem:[#allocation25_spill]] %s3149_s12 }
   0xe   :  { %3220 = sst [smem:[#allocation26_spill]] %s3150_s13 }
   0xf   :  { %3221 = sst [smem:[#allocation27_spill]] %s3151_s14 }
  0x10   :  { %3222 = sst [smem:[#allocation28_spill]] %s3165_s28 }
  0x11   :  { %33 = vsyncpa [#allocation3], 0 }
  0x12   :  { %35 = vsyncpa [#allocation3 + $0x1], 0  ;;  %s2680_s8 = smov 0   ;;  %s2682_s5 = smov 0  }
  0x13   :  { %s2684_s9 = smov 0   ;;  %s2686_s30 = smov 0  }
  0x14 LB: > { %3223 = sst [smem:[#allocation5_spill]] %s2506_s8  ;;  %s2701_s3 = sadd.s32 4294967295, %s2518_s30   ;;  %s2518_s30 = sphi %s2686_s30, %s3269_s30   ;;  %s2514_s9 = sphi %s2684_s9, %s3271_s9   ;;  %s2510_s5 = sphi %s2682_s5, %s3273_s5   ;;  %s2506_s8 = sphi %s2680_s8, %s3272_s8  }
  0x15   : > { %3224 = sst [smem:[#allocation6_spill]] %s2514_s9  ;;  %s2211_s6 = sadd.s32 4294967294, %s2518_s30  }
  0x16   : > { %3225 = sst [smem:[#allocation7_spill]] %s2518_s30  ;;  %s2705_s10 = sadd.s32 1, %s2518_s30  }
  0x17   : > { %3226 = sst [smem:[#allocation8_spill]] %s2701_s3  ;;  %s646_s0 = sadd.s32 1, %s2514_s9 }
  0x18   : > { %3227 = sst [smem:[#allocation9_spill]] %s2705_s10  ;;  %s643_s11 = ssub.s32 %s2518_s30, %s2705_s10 }
  0x19   : > { %p656_p0 = scmp.ne.s32.totalorder %s2514_s9, %s2510_s5  ;;  %p644_p1 = scmp.eq.s32.totalorder %s643_s11, 0 }
  0x1a   : > { %p657_p2 = scmp.eq.s32.totalorder %s2701_s3, 1  ;;  %p662_p3 = scmp.ne.s32.totalorder %s2510_s5, %s2506_s8 }
  0x1b   : > { %p663_p4 = scmp.eq.s32.totalorder %s2211_s6, 1  ;;  %p2214_p7 = scmp.ge.s32.totalorder %s2518_s30, 1 }
  0x1c   : > { %s2716_s29 = scalar_select %p644_p1, %s2514_s9, %s646_s0  }
  0x1d   : > { %p2718_p5 = por %p657_p2, %p656_p0  ;;  %p2722_p6 = por %p663_p4, %p662_p3 }
  0x1e   : > { %3228 = sst [smem:[#allocation10_spill]] %s2716_s29  ;;  %p774_p8 = scmp.lt.s32.totalorder %s2518_s30, 3 }
  0x1f   : > { %s3229_s2 = scalar_select %p2718_p5, 1, 0 }
  0x20   : > { %s3231_s7 = scalar_select %p2722_p6, 1, 0 }
  0x21   : > { %3230 = sst [smem:[#allocation11_spill]] %s3229_s2  ;;  %p775_p9 = pnand %p2214_p7, %p774_p8 }
  0x22   : > { %3232 = sst [smem:[#allocation12_spill]] %s3231_s7  ;;  %p852_p10 = scmp.lt.s32.totalorder (!%p775_p9), %s2701_s3, 1 }
  0x23   : > { %778 = sbr.rel (%p775_p9) target bundleno = 3997 (0xf9d), region = 132  ;;  %s3233_s4 = sld [smem:[#allocation16_spill]] (!%p775_p9) }
  0x24   : > { %s3234_s9 = sld [smem:[#allocation14_spill]] (!%p775_p9)  ;;  %s3192_s28 = smov (!%p775_p9), 1  }
  0x25   : > { %s3235_s30 = sld [smem:[#allocation15_spill]] (!%p775_p9)  ;;  %s3188_s7 = smov (!%p775_p9), 125  }
  0x26   : > { %s3181_s11 = smov (!%p775_p9), 9   ;;  %s3185_s12 = smov (!%p775_p9), 7  }
  0x27   : > { %s3201_s1 = smov (!%p775_p9), 126   ;;  %s3186_s8 = smov (!%p775_p9), 122  }
  0x28   : > { %v2520_v1 = vmov 0   ;;  %s853_s6 = scalar_select %p852_p10, %s2701_s3, 1  ;;  %vm867_vm0 = vcmask 64512   ;;  %vm958_vm1 = vcmask 7168   ;;  %vm961_vm2 = vcmask 15360  }
  0x29   : > { %v899_v0 = vld [vmem:[%s3233_s4] sm:$0xff]  ;;  %2359 = vset.pattern.permute.xlu0 %v2520_v1  ;;  %2395 = vset.pattern.permute.xlu2 %v2520_v1  ;;  %v900_v4 = vld [vmem:[%s3233_s4 + $0x8] sm:$0xff]  ;;  %s3190_s3 = smov 3   ;;  %vm964_vm3 = vcmask 23552   ;;  %vm969_vm4 = vcmask 31744   ;;  %vm972_vm5 = vcmask 39936  }
  0x2a   : > { %903 = vperm.xlu0 %2359, %v899_v0   ;;  %2396 = vset.pattern.permute.xlu1 %v2520_v1  ;;  %s2218_s0 = sshll.u32 %s853_s6, 3  ;;  %vm989_vm6 = vcmask 130048   ;;  %vm1028_vm7 = vcmask 1031168   ;;  %vm986_vm8 = vcmask 1039360   ;;  %vm1106_vm9 = vcmask 1006592   ;;  %s3246_s13 = sld [smem:[#allocation26_spill]] }
  0x2b   : > { %s860_s10 = scalar_lea.vmem %s3234_s9, %s2218_s0  ;;  %s3236_s2 = smov %s3235_s30  ;;  %v864_v2 = vld [vmem:[%s3235_s30] sm:$0xff]  ;;  %vm1054_vm10 = vcmask 1022976   ;;  %vm1132_vm11 = vcmask 998400   ;;  %vm1080_vm12 = vcmask 1014784   ;;  %vm1192_vm14 = vcmask 1041408  }
  0x2c   : > { %v866_v3 = vld [vmem:[%s860_s10] sm:$0xff]  ;;  %v865_v5 = vld [vmem:[%s3236_s2 + $0x8] sm:$0xff]  ;;  %s2302_s9 = sshll.u32 %s853_s6, 4  ;;  %s3237_s10 = sld [smem:[#allocation13_spill]] }
  0x2d   : > { %889 = vmatpush.msra.mxu0 %v866_v3  ;;  %s3184_s6 = smov 5   ;;  %s3199_s0 = smov 127  }
  0x2e   : > { %2219 = vmatmul.msk.f32.vlgmr.msra.gmra.mxu0 %vm867_vm0, %v864_v2  ;;  %s3195_s30 = smov 124   ;;  %s3249_s14 = sld [smem:[#allocation27_spill]] }
  0x32   : > { %908 = vperm.xlu0 %2359, %v900_v4   ;;  %s856_s29 = scalar_lea.vmem %s3237_s10, %s2302_s9  ;;  %s3182_s9 = smov 123  }
  0x33   : > { %v862_v8 = vld [vmem:[%s856_s29] sm:$0xff]  ;;  %v863_v9 = vld [vmem:[%s856_s29 + $0x8] sm:$0xff]  ;;  %s3241_s29 = sld [smem:[#allocation19_spill]]  ;;  %s3194_s10 = smov 6  }
  0x36   : > { %2220 = vmatmul.msk.f32.gmra.mxu0 %vm867_vm0, %v865_v5 }
  0x9c   : > { %v904_v6 = vpop.permute.xlu0 %903 }
  0xa4   : > { %v909_v13 = vpop.permute.xlu0 %908 }
  0xab   : > { %v891_v7 = vpop.f32.mrf.mxu0 }
  0xac   : > { %v897_v10 = vadd.f32 %v891_v7, %v862_v8 }
  0xae   : > { %v911_v14 = vadd.f32 %v904_v6, %v897_v10 }
  0xb3   : > { %v894_v11 = vpop.f32.mrf.mxu0 }
  0xb4   : > { %v898_v12 = vadd.f32 %v894_v11, %v863_v9 }
  0xb6   : > { %v912_v15 = vadd.f32 %v909_v13, %v898_v12 }
  0xb8   : > { %v2380_v16 = vpack.i.bf16 %v912_v15, %v911_v14 }
  0xba   : > { %2381 = vrot.lane.b32.xlu0 %v2380_v16, %s3192_s28  ;;  %2371 = vrot.lane.b32.xlu2 %v2380_v16, %s3190_s3 }
  0xbb   : > { %2361 = vrot.lane.b32.xlu1 %v2380_v16, %s3188_s7 }
  0xc2   : > { %2376 = vrot.lane.b32.xlu2 %v2380_v16, %s3184_s6  ;;  %s3240_s6 = sld [smem:[#allocation22_spill]] }
  0xc3   : > { %2366 = vrot.lane.b32.xlu1 %v2380_v16, %s3199_s0 }
  0xca   : > { %2391 = vrot.lane.b32.xlu2 %v2380_v16, %s3181_s11  ;;  %s3238_s11 = sld [smem:[#allocation18_spill]] }
  0xcb   : > { %2386 = vrot.lane.b32.xlu1 %v2380_v16, %s3185_s12  ;;  %s3239_s12 = sld [smem:[#allocation17_spill]] }
  0xd0   : > { %v913_v52 = vld [vmem:[%s3238_s11] sm:$0xf]  ;;  %s3197_s11 = smov 2  }
  0xd1   : > { %v976_v53 = vld [vmem:[%s3239_s12] sm:$0x3]  ;;  %v2224_v60 = vld [vmem:[%s3239_s12 + $0x4] sm:$0x3]  ;;  %v2221_v61 = vld [vmem:[%s3239_s12 + $0x2] sm:$0x3] }
  0xd2   : > { %v2230_v2 = vld [vmem:[%s3239_s12 + $0xa] sm:$0x3]  ;;  %v2226_v8 = vld [vmem:[%s3239_s12 + $0x6] sm:$0x3]  ;;  %v2232_v9 = vld [vmem:[%s3239_s12 + $0xc] sm:$0x3] }
  0xd3   : > { %v2228_v13 = vld [vmem:[%s3239_s12 + $0x8] sm:$0x3] }
 0x114   : > { %v2372_v17 = vpop.permute.xlu2 %2371 }
 0x115   : > { %v2374_v28 = vunpack.i.h.bf16 %v2372_v17  ;;  %v2373_v29 = vunpack.i.l.bf16 %v2372_v17 }
 0x11c   : > { %v2377_v19 = vpop.permute.xlu2 %2376 }
 0x11d   : > { %v2379_v36 = vunpack.i.h.bf16 %v2377_v19  ;;  %v2378_v37 = vunpack.i.l.bf16 %v2377_v19 }
 0x11f   : > { %v967_v43 = vsel %vm964_vm3, %v2373_v29, %v2378_v37  ;;  %v968_v44 = vsel %vm964_vm3, %v2374_v28, %v2379_v36 }
 0x124   : > { %v2392_v39 = vpop.permute.xlu2 %2391 }
 0x125   : > { %v2394_v45 = vunpack.i.h.bf16 %v2392_v39  ;;  %v2393_v46 = vunpack.i.l.bf16 %v2392_v39 }
 0x12c   : > { %v2382_v20 = vpop.permute.xlu0 %2381 }
 0x12d   : > { %v2362_v18 = vpop.permute.xlu1 %2361  ;;  %v2384_v26 = vunpack.i.h.bf16 %v2382_v20  ;;  %v2383_v27 = vunpack.i.l.bf16 %v2382_v20 }
 0x12e   : > { %v2364_v22 = vunpack.i.h.bf16 %v2362_v18  ;;  %v2363_v23 = vunpack.i.l.bf16 %v2362_v18 }
 0x135   : > { %v2367_v21 = vpop.permute.xlu1 %2366 }
 0x136   : > { %v2369_v24 = vunpack.i.h.bf16 %v2367_v21  ;;  %v2368_v25 = vunpack.i.l.bf16 %v2367_v21 }
 0x138   : > { %v959_v30 = vsel %vm958_vm1, %v2363_v23, %v2368_v25  ;;  %v960_v31 = vsel %vm958_vm1, %v2364_v22, %v2369_v24 }
 0x139   : > { %v962_v32 = vsel %vm961_vm2, %v959_v30, %v2383_v27  ;;  %v963_v33 = vsel %vm961_vm2, %v960_v31, %v2384_v26 }
 0x13a   : > { %v965_v34 = vsel %vm964_vm3, %v962_v32, %v2373_v29  ;;  %v966_v35 = vsel %vm964_vm3, %v963_v33, %v2374_v28 }
 0x13b   : > { %v975_v38 = vpack.c.bf16 %v966_v35, %v965_v34 }
 0x13d   : > { %v2387_v40 = vpop.permute.xlu1 %2386  ;;  %982 = vrot.lane.b32.xlu2 %v975_v38, %s3199_s0  ;;  %1024 = vrot.lane.b32.xlu0 %v975_v38, %s3201_s1 }
 0x13e   : > { %v2389_v41 = vunpack.i.h.bf16 %v2387_v40  ;;  %v2388_v42 = vunpack.i.l.bf16 %v2387_v40  ;;  %1016 = vmatpush.bf16.msra.mxu2 %v975_v38 }
 0x140   : > { %v971_v47 = vsel %vm969_vm4, %v968_v44, %v2389_v41  ;;  %v970_v48 = vsel %vm969_vm4, %v967_v43, %v2388_v42 }
 0x141   : > { %v974_v49 = vsel %vm972_vm5, %v971_v47, %v2394_v45  ;;  %v973_v50 = vsel %vm972_vm5, %v970_v48, %v2393_v46  ;;  %2223 = vmatmul.msk.bf16.vlgmr.msra.gmra.mxu2 %vm989_vm6, %v976_v53 }
 0x142   : > { %v977_v51 = vpack.c.bf16 %v974_v49, %v973_v50  ;;  %v1267_v49 = vld [vmem:[%s3240_s6] sm:$0xf]  ;;  %s3255_s6 = smov 127  }
 0x143   : > { %v1178_v50 = vld [vmem:[%s3241_s29] sm:$0x1] }
 0x144   : > { %1026 = vrot.lane.b32.xlu1 %v977_v51, %s3201_s1 }
 0x145   : > { %1104 = vrot.lane.b32.xlu2 %v977_v51, %s3182_s9  ;;  %984 = vrot.lane.b32.xlu0 %v977_v51, %s3199_s0 }
 0x14c   : > { %1102 = vrot.lane.b32.xlu1 %v975_v38, %s3182_s9  ;;  %s3198_s9 = smov 4  }
 0x14d   : > { %1128 = vrot.lane.b32.xlu2 %v975_v38, %s3186_s8  ;;  %1050 = vrot.lane.b32.xlu0 %v975_v38, %s3188_s7 }
 0x154   : > { %1052 = vrot.lane.b32.xlu1 %v977_v51, %s3188_s7  ;;  %s3244_s7 = sld [smem:[#allocation24_spill]] }
 0x155   : > { %1078 = vrot.lane.b32.xlu2 %v977_v51, %s3195_s30  ;;  %1130 = vrot.lane.b32.xlu0 %v977_v51, %s3186_s8  ;;  %s3243_s8 = sld [smem:[#allocation21_spill]] }
 0x15c   : > { %1076 = vrot.lane.b32.xlu1 %v975_v38, %s3195_s30 }
 0x15d   : > { %1154 = vperm.xlu0 %2359, %v913_v52  }
 0x197   : > { %v983_v55 = vpop.permute.xlu2 %982 }
 0x19f   : > { %v1105_v62 = vpop.permute.xlu2 %1104 }
 0x1a7   : > { %v1129_v3 = vpop.permute.xlu2 %1128 }
 0x1af   : > { %v1025_v54 = vpop.permute.xlu0 %1024  ;;  %v1079_v10 = vpop.permute.xlu2 %1078 }
 0x1b6   : > { %v1027_v56 = vpop.permute.xlu1 %1026 }
 0x1b7   : > { %v985_v57 = vpop.permute.xlu0 %984  ;;  %v1029_v58 = vsel %vm1028_vm7, %v1025_v54, %v1027_v56  ;;  %v2238_v56 = vld [vmem:[%s3241_s29 + $0x2] sm:$0x1] }
 0x1b8   : > { %1041 = vmatpush.bf16.msra.mxu3 %v1029_v58  ;;  %v987_v59 = vsel %vm986_vm8, %v983_v55, %v985_v57 }
 0x1b9   : > { %1000 = vmatpush.bf16.msra.mxu1 %v987_v59 }
 0x1bb   : > { %2225 = vmatmul.msk.bf16.vlgmr.msra.gmra.mxu3 %vm989_vm6, %v2224_v60 }
 0x1bc   : > { %2222 = vmatmul.msk.bf16.vlgmr.msra.gmra.mxu1 %vm989_vm6, %v2221_v61  ;;  %v2235_v61 = vld [vmem:[%s3241_s29 + $0x1] sm:$0x1] }
 0x1be   : > { %v1103_v63 = vpop.permute.xlu1 %1102 }
 0x1bf   : > { %v1051_v0 = vpop.permute.xlu0 %1050  ;;  %v1107_v1 = vsel %vm1106_vm9, %v1103_v63, %v1105_v62 }
 0x1c0   : > { %1119 = vmatpush.bf16.msrb.mxu2 %v1107_v1 }
 0x1c3   : > { %2231 = vmatmul.msk.bf16.vlgmr.msrb.gmra.mxu2 %vm989_vm6, %v2230_v2 }
 0x1c4   : > { %v1018_v14 = vpop.f32.mrf.mxu2 }
 0x1c6   : > { %v1053_v4 = vpop.permute.xlu1 %1052 }
 0x1c7   : > { %v1131_v5 = vpop.permute.xlu0 %1130  ;;  %v1055_v6 = vsel %vm1054_vm10, %v1051_v0, %v1053_v4 }
 0x1c8   : > { %1067 = vmatpush.bf16.msrb.mxu0 %v1055_v6  ;;  %v1133_v7 = vsel %vm1132_vm11, %v1129_v3, %v1131_v5 }
 0x1c9   : > { %1145 = vmatpush.bf16.msrb.mxu3 %v1133_v7 }
 0x1cb   : > { %2227 = vmatmul.msk.bf16.vlgmr.msrb.gmra.mxu0 %vm989_vm6, %v2226_v8 }
 0x1cc   : > { %2233 = vmatmul.msk.bf16.vlgmr.msrb.gmra.mxu3 %vm989_vm6, %v2232_v9  ;;  %v1020_v15 = vpop.f32.mrf.mxu2 }
 0x1cd   : > { %v1268_v15 = vld [vmem:[%s3243_s8] sm:$0x3]  ;;  %s3247_s8 = sld [smem:[#allocation25_spill]] }
 0x1ce   : > { %v1077_v11 = vpop.permute.xlu1 %1076 }
 0x1cf   : > { %v1081_v12 = vsel %vm1080_vm12, %v1077_v11, %v1079_v10  ;;  %v1155_v32 = vpop.permute.xlu0 %1154 }
 0x1d0   : > { %1093 = vmatpush.bf16.msrb.mxu1 %v1081_v12 }
 0x1d3   : > { %2229 = vmatmul.msk.bf16.vlgmr.msrb.gmra.mxu1 %vm989_vm6, %v2228_v13 }
 0x239   : > { %v1002_v16 = vpop.f32.mrf.mxu1 }
 0x23a   : > { %v1019_v22 = vadd.f32 %v1018_v14, %v1002_v16 }
 0x23e   : > { %v1043_v17 = vpop.f32.mrf.mxu3 }
 0x23f   : > { %v1047_v23 = vadd.f32 %v1043_v17, %v1019_v22 }
 0x241   : > { %v1004_v18 = vpop.f32.mrf.mxu1 }
 0x246   : > { %v1045_v19 = vpop.f32.mrf.mxu3  ;;  %v1121_v20 = vpop.f32.mrf.mxu2 }
 0x248   : > { %v1069_v21 = vpop.f32.mrf.mxu0 }
 0x249   : > { %v1073_v25 = vadd.f32 %v1069_v21, %v1047_v23 }
 0x24e   : > { %v1123_v24 = vpop.f32.mrf.mxu2 }
 0x24f   : > { %v1147_v26 = vpop.f32.mrf.mxu3 }
 0x250   : > { %v1071_v27 = vpop.f32.mrf.mxu0  ;;  %v1095_v28 = vpop.f32.mrf.mxu1 }
 0x251   : > { %v1099_v29 = vadd.f32 %v1095_v28, %v1073_v25 }
 0x253   : > { %v1125_v30 = vadd.f32 %v1121_v20, %v1099_v29 }
 0x255   : > { %v1151_v31 = vadd.f32 %v1147_v26, %v1125_v30 }
 0x257   : > { %v2818_v33 = vadd.f32 %v1155_v32, %v1151_v31  ;;  %v1149_v34 = vpop.f32.mrf.mxu3 }
 0x258   : > { %v1097_v35 = vpop.f32.mrf.mxu1 }
 0x259   : > { %v1159_v36 = vmin.f32 %v2818_v33, 0.0  ;;  %vm1158_vm13 = vcmp.gt.f32.partialorder %v2818_v33, 0.0 }
 0x25b   : > { %v1160_v37 = vmul.f32 1.442695, %v1159_v36 }
 0x25d   : > { %2432 = vpow2.f32 %v1160_v37  ;;  %v1302_v37 = vld [vmem:[%s3244_s7] sm:$0x3]  ;;  %s3251_s7 = smov 4  }
 0x263   : > { %v2433_v38 = vpop.eup %2432 }
 0x264   : > { %v2234_v39 = vadd.f32 -1.0, %v2433_v38 }
 0x266   : > { %v1163_v40 = vsel %vm1158_vm13, %v2818_v33, %v2234_v39  ;;  %vm1278_vm13 = vcmask 1040384  }
 0x267   : > { %1172 = vrot.lane.b32.xlu0 %v1163_v40, %s3190_s3  ;;  %1169 = vrot.lane.b32.xlu2 %v1163_v40, %s3192_s28  ;;  %s3242_s28 = sld [smem:[#allocation20_spill]]  ;;  %s3250_s3 = smov 3  }
 0x268   : > { %1166 = vrot.lane.b32.xlu1 %v1163_v40, %s3199_s0 }
 0x26d   : > { %v1164_v51 = vld [vmem:[%s3242_s28] sm:$0x3]  ;;  %s3248_s28 = smov 1  }
 0x2c1   : > { %v1170_v41 = vpop.permute.xlu2 %1169 }
 0x2d9   : > { %v1173_v42 = vpop.permute.xlu0 %1172 }
 0x2da   : > { %v1176_v43 = vsel %vm958_vm1, %v1170_v41, %v1173_v42  ;;  %v1167_v44 = vpop.permute.xlu1 %1166 }
 0x2db   : > { %v1179_v45 = vpack.c.bf16 %v1176_v43, %v1176_v43  ;;  %v1175_v46 = vsel %vm958_vm1, %v1167_v44, %v1170_v41 }
 0x2dc   : > { %v1177_v47 = vpack.c.bf16 %v1175_v46, %v1175_v46 }
 0x2dd   : > { %1232 = vrot.lane.b32.xlu2 %v1179_v45, %s3201_s1 }
 0x2de   : > { %1184 = vrot.lane.b32.xlu0 %v1177_v47, %s3199_s0  ;;  %1230 = vrot.lane.b32.xlu1 %v1177_v47, %s3201_s1  ;;  %v1213_v48 = vsel %vm1192_vm14, %v1177_v47, 0 }
 0x2df   : > { %1222 = vmatpush.bf16.msra.mxu1 %v1213_v48 }
 0x2e2   : > { %2237 = vmatmul.msk.bf16.vlgmr.msra.gmra.mxu1 %vm969_vm4, %v1178_v50 }
 0x2e5   : > { %1257 = vperm.xlu2 %2395, %v1164_v51  }
 0x2e6   : > { %1272 = vperm.xlu0 %2359, %v1267_v49   ;;  %1186 = vrot.lane.b32.xlu1 %v1179_v45, %s3199_s0 }
 0x337   : > { %v1233_v52 = vpop.permute.xlu2 %1232 }
 0x33f   : > { %v1258_v3 = vpop.permute.xlu2 %1257 }
 0x350   : > { %v1231_v53 = vpop.permute.xlu1 %1230  ;;  %v1185_v57 = vpop.permute.xlu0 %1184 }
 0x351   : > { %v1234_v54 = vsel %vm1028_vm7, %v1231_v53, %v1233_v52  ;;  %v1409_v52 = vld [vmem:[%s3246_s13] sm:$0xf] }
 0x352   : > { %v1239_v55 = vsel %vm1192_vm14, %v1234_v54, 0 }
 0x353   : > { %1248 = vmatpush.bf16.msra.mxu2 %v1239_v55 }
 0x356   : > { %2239 = vmatmul.msk.bf16.vlgmr.msra.gmra.mxu2 %vm969_vm4, %v2238_v56 }
 0x358   : > { %v1187_v58 = vpop.permute.xlu1 %1186  ;;  %v1273_v16 = vpop.permute.xlu0 %1272 }
 0x359   : > { %v1188_v59 = vsel %vm986_vm8, %v1185_v57, %v1187_v58 }
 0x35a   : > { %v1194_v60 = vsel %vm1192_vm14, %v1188_v59, 0 }
 0x35b   : > { %1203 = vmatpush.bf16.msra.mxu0 %v1194_v60 }
 0x35e   : > { %2236 = vmatmul.msk.bf16.vlgmr.msra.gmra.mxu0 %vm969_vm4, %v2235_v61 }
 0x35f   : > { %v1224_v62 = vpop.f32.mrf.mxu1 }
 0x367   : > { %v1226_v63 = vpop.f32.mrf.mxu1 }
 0x3d9   : > { %v1250_v0 = vpop.f32.mrf.mxu2 }
 0x3db   : > { %v1205_v1 = vpop.f32.mrf.mxu0 }
 0x3dc   : > { %v1225_v2 = vadd.f32 %v1224_v62, %v1205_v1 }
 0x3de   : > { %v1254_v4 = vadd.f32 %v1250_v0, %v1225_v2 }
 0x3e0   : > { %v1260_v5 = vadd.f32 %v1258_v3, %v1254_v4  ;;  %v1410_v3 = vld [vmem:[%s3247_s8] sm:$0x3]  ;;  %s3262_s8 = smov 123  }
 0x3e1   : > { %v1252_v6 = vpop.f32.mrf.mxu2 }
 0x3e2   : > { %v1262_v7 = vmin.f32 %v1260_v5, 0.0  ;;  %vm1261_vm15 = vcmp.gt.f32.partialorder %v1260_v5, 0.0 }
 0x3e3   : > { %v1207_v8 = vpop.f32.mrf.mxu0 }
 0x3e4   : > { %v1263_v9 = vmul.f32 1.442695, %v1262_v7 }
 0x3e6   : > { %2434 = vpow2.f32 %v1263_v9 }
 0x3ec   : > { %v2435_v10 = vpop.eup %2434 }
 0x3ed   : > { %v2240_v11 = vadd.f32 -1.0, %v2435_v10 }
 0x3ef   : > { %v1266_v12 = vsel %vm1261_vm15, %v1260_v5, %v2240_v11 }
 0x3f0   : > { %v1269_v13 = vpack.c.bf16 %v1266_v12, %v1266_v12 }
 0x3f2   : > { %v1280_v14 = vsel %vm1278_vm13, %v1269_v13, 0 }
 0x3f3   : > { %1289 = vmatpush.bf16.msra.mxu3 %v1280_v14  ;;  %v1443_v14 = vld [vmem:[%s3152_s15] sm:$0xff] }
 0x3f6   : > { %2241 = vmatmul.msk.bf16.vlgmr.msra.gmra.mxu3 %vm961_vm2, %v1268_v15 }
 0x479   : > { %v1291_v17 = vpop.f32.mrf.mxu3 }
 0x47a   : > { %v1292_v18 = vadd.f32 %v1291_v17, %v1273_v16 }
 0x47c   : > { %v2861_v19 = vadd.f32 %v1292_v18, %v2818_v33 }
 0x47e   : > { %v1297_v20 = vmin.f32 %v2861_v19, 0.0  ;;  %vm1296_vm15 = vcmp.gt.f32.partialorder %v2861_v19, 0.0 }
 0x480   : > { %v1298_v21 = vmul.f32 1.442695, %v1297_v20 }
 0x481   : > { %v1293_v22 = vpop.f32.mrf.mxu3 }
 0x482   : > { %2436 = vpow2.f32 %v1298_v21  ;;  %v1453_v21 = vld [vmem:[%s3249_s14] sm:$0xf] }
 0x488   : > { %v2437_v23 = vpop.eup %2436 }
 0x489   : > { %v2242_v24 = vadd.f32 -1.0, %v2437_v23 }
 0x48b   : > { %v1301_v25 = vsel %vm1296_vm15, %v2861_v19, %v2242_v24 }
 0x48c   : > { %1310 = vrot.lane.b32.xlu0 %v1301_v25, %s3198_s9  ;;  %1307 = vrot.lane.b32.xlu2 %v1301_v25, %s3197_s11  ;;  %s3253_s9 = smov 6   ;;  %s3254_s11 = smov 124  }
 0x48d   : > { %1304 = vrot.lane.b32.xlu1 %v1301_v25, %s3201_s1 }
 0x495   : > { %1313 = vrot.lane.b32.xlu1 %v1301_v25, %s3194_s10  ;;  %s3245_s10 = sld [smem:[#allocation23_spill]] }
 0x49b   : > { %v1321_v38 = vld [vmem:[%s3245_s10] sm:$0x1]  ;;  %v2243_v44 = vld [vmem:[%s3245_s10 + $0x1] sm:$0x1]  ;;  %v2246_v48 = vld [vmem:[%s3245_s10 + $0x2] sm:$0x1] }
 0x4e6   : > { %v1308_v27 = vpop.permute.xlu2 %1307 }
 0x4fe   : > { %v1311_v31 = vpop.permute.xlu0 %1310 }
 0x4ff   : > { %v1305_v26 = vpop.permute.xlu1 %1304  ;;  %v1318_v33 = vsel %vm961_vm2, %v1308_v27, %v1311_v31 }
 0x500   : > { %v1316_v28 = vsel %vm958_vm1, %v1305_v26, %v1301_v25  ;;  %v2251_v26 = vld [vmem:[%s3249_s14 + $0x4] sm:$0xf] }
 0x501   : > { %v1317_v29 = vsel %vm961_vm2, %v1316_v28, %v1308_v27 }
 0x502   : > { %v1320_v30 = vpack.c.bf16 %v1317_v29, %v1317_v29 }
 0x504   : > { %1327 = vrot.lane.b32.xlu1 %v1320_v30, %s3201_s1  ;;  %1372 = vrot.lane.b32.xlu2 %v1320_v30, %s3195_s30  ;;  %v1355_v32 = vsel %vm1192_vm14, %v1320_v30, 0 }
 0x505   : > { %1364 = vmatpush.bf16.msrb.mxu1 %v1355_v32 }
 0x507   : > { %v1314_v34 = vpop.permute.xlu1 %1313 }
 0x508   : > { %v1319_v35 = vsel %vm964_vm3, %v1318_v33, %v1314_v34  ;;  %2245 = vmatmul.msk.bf16.vlgmr.msrb.gmra.mxu1 %vm969_vm4, %v1321_v38 }
 0x509   : > { %v1322_v36 = vpack.c.bf16 %v1319_v35, %v1319_v35 }
 0x50b   : > { %1374 = vrot.lane.b32.xlu0 %v1322_v36, %s3195_s30  ;;  %s3252_s30 = smov 2  }
 0x50c   : > { %1329 = vrot.lane.b32.xlu2 %v1322_v36, %s3201_s1  ;;  %1414 = vperm.xlu1 %2396, %v1409_v52  }
 0x513   : > { %1399 = vperm.xlu0 %2359, %v1302_v37  }
 0x55e   : > { %v1373_v39 = vpop.permute.xlu2 %1372 }
 0x566   : > { %v1330_v40 = vpop.permute.xlu2 %1329 }
 0x576   : > { %v1328_v41 = vpop.permute.xlu1 %1327 }
 0x577   : > { %v1331_v42 = vsel %vm1028_vm7, %v1328_v41, %v1330_v40 }
 0x578   : > { %v1336_v43 = vsel %vm1192_vm14, %v1331_v42, 0 }
 0x579   : > { %1345 = vmatpush.bf16.msrb.mxu0 %v1336_v43 }
 0x57c   : > { %2244 = vmatmul.msk.bf16.vlgmr.msrb.gmra.mxu0 %vm969_vm4, %v2243_v44 }
 0x57d   : > { %v1375_v45 = vpop.permute.xlu0 %1374 }
 0x57e   : > { %v1376_v46 = vsel %vm1080_vm12, %v1373_v39, %v1375_v45  ;;  %v1415_v4 = vpop.permute.xlu1 %1414 }
 0x57f   : > { %v1381_v47 = vsel %vm1192_vm14, %v1376_v46, 0 }
 0x580   : > { %1390 = vmatpush.bf16.msrb.mxu2 %v1381_v47  ;;  %v1514_v47 = vld [vmem:[%s3154_s17] sm:$0xf] }
 0x583   : > { %2247 = vmatmul.msk.bf16.vlgmr.msrb.gmra.mxu2 %vm969_vm4, %v2246_v48  ;;  %v1617_v48 = vld [vmem:[%s3156_s19] sm:$0xff] }
 0x585   : > { %v1366_v49 = vpop.f32.mrf.mxu1  ;;  %v1400_v57 = vpop.permute.xlu0 %1399 }
 0x58d   : > { %v1368_v50 = vpop.f32.mrf.mxu1 }
 0x5f9   : > { %v1347_v51 = vpop.f32.mrf.mxu0 }
 0x5fa   : > { %v1367_v54 = vadd.f32 %v1366_v49, %v1347_v51  ;;  %v1528_v49 = vld [vmem:[%s3153_s16] sm:$0x3] }
 0x601   : > { %v1349_v53 = vpop.f32.mrf.mxu0 }
 0x606   : > { %v1392_v55 = vpop.f32.mrf.mxu2 }
 0x607   : > { %v1396_v56 = vadd.f32 %v1392_v55, %v1367_v54  ;;  %v2255_v54 = vld [vmem:[%s3153_s16 + $0x2] sm:$0x3] }
 0x609   : > { %v1402_v58 = vadd.f32 %v1400_v57, %v1396_v56 }
 0x60b   : > { %v1404_v59 = vmin.f32 %v1402_v58, 0.0  ;;  %vm1403_vm15 = vcmp.gt.f32.partialorder %v1402_v58, 0.0 }
 0x60d   : > { %v1405_v60 = vmul.f32 1.442695, %v1404_v59  ;;  %v2258_v59 = vld [vmem:[%s3153_s16 + $0x4] sm:$0x3] }
 0x60e   : > { %v1394_v61 = vpop.f32.mrf.mxu2 }
 0x60f   : > { %2438 = vpow2.f32 %v1405_v60 }
 0x615   : > { %v2439_v62 = vpop.eup %2438 }
 0x616   : > { %v2248_v63 = vadd.f32 -1.0, %v2439_v62 }
 0x618   : > { %v1408_v0 = vsel %vm1403_vm15, %v1402_v58, %v2248_v63 }
 0x619   : > { %v1411_v1 = vpack.c.bf16 %v1408_v0, %v1408_v0 }
 0x61b   : > { %v1421_v2 = vsel %vm1278_vm13, %v1411_v1, 0 }
 0x61c   : > { %1430 = vmatpush.bf16.msrb.mxu3 %v1421_v2 }
 0x61f   : > { %2249 = vmatmul.msk.bf16.vlgmr.msrb.gmra.mxu3 %vm961_vm2, %v1410_v3 }
 0x6a2   : > { %v1432_v5 = vpop.f32.mrf.mxu3 }
 0x6a3   : > { %v1433_v6 = vadd.f32 %v1432_v5, %v1415_v4 }
 0x6a5   : > { %v1436_v7 = vadd.f32 %v1433_v6, %v2861_v19 }
 0x6a7   : > { %v1438_v8 = vmin.f32 %v1436_v7, 0.0  ;;  %vm1437_vm15 = vcmp.gt.f32.partialorder %v1436_v7, 0.0 }
 0x6a9   : > { %v1439_v9 = vmul.f32 1.442695, %v1438_v8 }
 0x6aa   : > { %v1434_v10 = vpop.f32.mrf.mxu3 }
 0x6ab   : > { %2440 = vpow2.f32 %v1439_v9 }
 0x6b1   : > { %v2441_v11 = vpop.eup %2440 }
 0x6b2   : > { %v2250_v12 = vadd.f32 -1.0, %v2441_v11 }
 0x6b4   : > { %v1442_v13 = vsel %vm1437_vm15, %v1436_v7, %v2250_v12  ;;  %vm1542_vm15 = vcmask 1043456  }
 0x6b5   : > { %1448 = vrot.lane.b32.xlu0 %v1442_v13, %s3248_s28  ;;  %1445 = vrot.lane.b32.xlu2 %v1442_v13, %s3199_s0  ;;  %v1618_v13 = vld [vmem:[%s3155_s18] sm:$0xf] }
 0x6bd   : > { %1504 = vperm.xlu0 %2359, %v1443_v14  }
 0x70f   : > { %v1446_v15 = vpop.permute.xlu2 %1445 }
 0x727   : > { %v1449_v16 = vpop.permute.xlu0 %1448 }
 0x728   : > { %v1451_v17 = vsel %vm958_vm1, %v1446_v15, %v1449_v16  ;;  %v1454_v18 = vpack.c.bf16 %v1449_v16, %v1449_v16 }
 0x729   : > { %v1452_v19 = vpack.c.bf16 %v1451_v17, %v1451_v17 }
 0x72a   : > { %1461 = vrot.lane.b32.xlu2 %v1454_v18, %s3199_s0 }
 0x72b   : > { %1459 = vrot.lane.b32.xlu1 %v1452_v19, %s3199_s0  ;;  %v1487_v20 = vsel %vm1192_vm14, %v1452_v19, 0 }
 0x72c   : > { %1496 = vmatpush.bf16.msra.mxu1 %v1487_v20 }
 0x72f   : > { %2253 = vmatmul.msk.bf16.vlgmr.msra.gmra.mxu1 %vm969_vm4, %v1453_v21  ;;  %v1505_v31 = vpop.permute.xlu0 %1504 }
 0x784   : > { %v1462_v22 = vpop.permute.xlu2 %1461 }
 0x79d   : > { %v1460_v23 = vpop.permute.xlu1 %1459 }
 0x79e   : > { %v1463_v24 = vsel %vm986_vm8, %v1460_v23, %v1462_v22 }
 0x79f   : > { %v1468_v25 = vsel %vm1192_vm14, %v1463_v24, 0 }
 0x7a0   : > { %1477 = vmatpush.bf16.msra.mxu0 %v1468_v25 }
 0x7a3   : > { %2252 = vmatmul.msk.bf16.vlgmr.msra.gmra.mxu0 %vm969_vm4, %v2251_v26 }
 0x7ac   : > { %v1498_v27 = vpop.f32.mrf.mxu1 }
 0x7b4   : > { %v1500_v28 = vpop.f32.mrf.mxu1 }
 0x820   : > { %v1479_v29 = vpop.f32.mrf.mxu0 }
 0x821   : > { %v1499_v30 = vadd.f32 %v1498_v27, %v1479_v29 }
 0x823   : > { %v2926_v32 = vadd.f32 %v1505_v31, %v1499_v30 }
 0x825   : > { %v1509_v33 = vmin.f32 %v2926_v32, 0.0  ;;  %vm1508_vm13 = vcmp.gt.f32.partialorder %v2926_v32, 0.0 }
 0x827   : > { %v1510_v34 = vmul.f32 1.442695, %v1509_v33 }
 0x828   : > { %v1481_v35 = vpop.f32.mrf.mxu0 }
 0x829   : > { %2442 = vpow2.f32 %v1510_v34  ;;  %v1758_v35 = vld [vmem:[%s3160_s23] sm:$0xff] }
 0x82f   : > { %v2443_v36 = vpop.eup %2442 }
 0x830   : > { %v2254_v37 = vadd.f32 -1.0, %v2443_v36  ;;  %v1651_v36 = vld [vmem:[%s3158_s21] sm:$0xf] }
 0x832   : > { %v1513_v38 = vsel %vm1508_vm13, %v2926_v32, %v2254_v37  ;;  %v1670_v37 = vld [vmem:[%s3157_s20] sm:$0x3] }
 0x833   : > { %1522 = vrot.lane.b32.xlu0 %v1513_v38, %s3250_s3  ;;  %1519 = vrot.lane.b32.xlu2 %v1513_v38, %s3248_s28 }
 0x834   : > { %1516 = vrot.lane.b32.xlu1 %v1513_v38, %s3199_s0 }
 0x88d   : > { %v1520_v39 = vpop.permute.xlu2 %1519 }
 0x8a5   : > { %v1523_v40 = vpop.permute.xlu0 %1522 }
 0x8a6   : > { %v1526_v41 = vsel %vm958_vm1, %v1520_v39, %v1523_v40  ;;  %v1517_v42 = vpop.permute.xlu1 %1516 }
 0x8a7   : > { %v1529_v43 = vpack.c.bf16 %v1526_v41, %v1526_v41  ;;  %v1525_v44 = vsel %vm958_vm1, %v1517_v42, %v1520_v39 }
 0x8a8   : > { %v1527_v45 = vpack.c.bf16 %v1525_v44, %v1525_v44 }
 0x8a9   : > { %1536 = vrot.lane.b32.xlu2 %v1529_v43, %s3199_s0 }
 0x8aa   : > { %1580 = vrot.lane.b32.xlu0 %v1527_v45, %s3201_s1  ;;  %1534 = vrot.lane.b32.xlu1 %v1527_v45, %s3199_s0  ;;  %v1563_v46 = vsel %vm1542_vm15, %v1527_v45, 0 }
 0x8ab   : > { %1572 = vmatpush.bf16.msra.mxu3 %v1563_v46 }
 0x8ae   : > { %2257 = vmatmul.msk.bf16.vlgmr.msra.gmra.mxu3 %vm867_vm0, %v1528_v49 }
 0x8b1   : > { %1607 = vperm.xlu2 %2395, %v1514_v47   ;;  %v2263_v47 = vld [vmem:[%s3157_s20 + $0x2] sm:$0x3] }
 0x8b2   : > { %1622 = vperm.xlu0 %2359, %v1617_v48   ;;  %1582 = vrot.lane.b32.xlu1 %v1529_v43, %s3201_s1  ;;  %v2266_v43 = vld [vmem:[%s3157_s20 + $0x4] sm:$0x3] }
 0x903   : > { %v1537_v50 = vpop.permute.xlu2 %1536 }
 0x90b   : > { %v1608_v2 = vpop.permute.xlu2 %1607 }
 0x91c   : > { %v1535_v51 = vpop.permute.xlu1 %1534  ;;  %v1581_v55 = vpop.permute.xlu0 %1580 }
 0x91d   : > { %v1538_v52 = vsel %vm986_vm8, %v1535_v51, %v1537_v50 }
 0x91e   : > { %v1544_v53 = vsel %vm1542_vm15, %v1538_v52, 0 }
 0x91f   : > { %1553 = vmatpush.bf16.msra.mxu2 %v1544_v53 }
 0x922   : > { %2256 = vmatmul.msk.bf16.vlgmr.msra.gmra.mxu2 %vm867_vm0, %v2255_v54 }
 0x924   : > { %v1583_v56 = vpop.permute.xlu1 %1582  ;;  %v1623_v14 = vpop.permute.xlu0 %1622 }
 0x925   : > { %v1584_v57 = vsel %vm1028_vm7, %v1581_v55, %v1583_v56 }
 0x926   : > { %v1589_v58 = vsel %vm1542_vm15, %v1584_v57, 0 }
 0x927   : > { %1598 = vmatpush.bf16.msrb.mxu0 %v1589_v58 }
 0x92a   : > { %2259 = vmatmul.msk.bf16.vlgmr.msrb.gmra.mxu0 %vm867_vm0, %v2258_v59 }
 0x931   : > { %v1574_v60 = vpop.f32.mrf.mxu3 }
 0x939   : > { %v1576_v61 = vpop.f32.mrf.mxu3 }
 0x9a5   : > { %v1555_v62 = vpop.f32.mrf.mxu2 }
 0x9a6   : > { %v1575_v63 = vadd.f32 %v1574_v60, %v1555_v62 }
 0x9a7   : > { %v1600_v0 = vpop.f32.mrf.mxu0 }
 0x9a8   : > { %v1604_v1 = vadd.f32 %v1600_v0, %v1575_v63 }
 0x9aa   : > { %v1610_v3 = vadd.f32 %v1608_v2, %v1604_v1  ;;  %v1759_v1 = vld [vmem:[%s3159_s22] sm:$0xf] }
 0x9ac   : > { %v1612_v4 = vmin.f32 %v1610_v3, 0.0  ;;  %vm1611_vm13 = vcmp.gt.f32.partialorder %v1610_v3, 0.0 }
 0x9ad   : > { %v1557_v5 = vpop.f32.mrf.mxu2 }
 0x9ae   : > { %v1613_v6 = vmul.f32 1.442695, %v1612_v4 }
 0x9af   : > { %v1602_v7 = vpop.f32.mrf.mxu0 }
 0x9b0   : > { %2444 = vpow2.f32 %v1613_v6 }
 0x9b6   : > { %v2445_v8 = vpop.eup %2444 }
 0x9b7   : > { %v2260_v9 = vadd.f32 -1.0, %v2445_v8 }
 0x9b9   : > { %v1616_v10 = vsel %vm1611_vm13, %v1610_v3, %v2260_v9 }
 0x9ba   : > { %v1619_v11 = vpack.c.bf16 %v1616_v10, %v1616_v10 }
 0x9bc   : > { %v1629_v12 = vsel %vm1192_vm14, %v1619_v11, 0 }
 0x9bd   : > { %1638 = vmatpush.bf16.msrb.mxu1 %v1629_v12  ;;  %v1792_v12 = vld [vmem:[%s3162_s25] sm:$0xff] }
 0x9c0   : > { %2261 = vmatmul.msk.bf16.vlgmr.msrb.gmra.mxu1 %vm969_vm4, %v1618_v13 }
 0xa3d   : > { %v1640_v15 = vpop.f32.mrf.mxu1 }
 0xa3e   : > { %v1641_v16 = vadd.f32 %v1640_v15, %v1623_v14 }
 0xa40   : > { %v2969_v17 = vadd.f32 %v1641_v16, %v2926_v32 }
 0xa42   : > { %v1646_v18 = vmin.f32 %v2969_v17, 0.0  ;;  %vm1645_vm13 = vcmp.gt.f32.partialorder %v2969_v17, 0.0 }
 0xa44   : > { %v1647_v19 = vmul.f32 1.442695, %v1646_v18 }
 0xa45   : > { %v1642_v20 = vpop.f32.mrf.mxu1 }
 0xa46   : > { %2446 = vpow2.f32 %v1647_v19  ;;  %v1793_v19 = vld [vmem:[%s3162_s25 + $0x8] sm:$0xff]  ;;  %v2303_v20 = vld [vmem:[%s3161_s24] sm:$0xff] }
 0xa4c   : > { %v2447_v21 = vpop.eup %2446 }
 0xa4d   : > { %v2262_v22 = vadd.f32 -1.0, %v2447_v21 }
 0xa4f   : > { %v1650_v23 = vsel %vm1645_vm13, %v2969_v17, %v2262_v22 }
 0xa50   : > { %1659 = vrot.lane.b32.xlu0 %v1650_v23, %s3251_s7  ;;  %1656 = vrot.lane.b32.xlu2 %v1650_v23, %s3252_s30  ;;  %s3257_s7 = smov 7   ;;  %s3258_s30 = smov 5  }
 0xa51   : > { %1653 = vrot.lane.b32.xlu1 %v1650_v23, %s3201_s1 }
 0xa59   : > { %1662 = vrot.lane.b32.xlu1 %v1650_v23, %s3253_s9  ;;  %s3259_s9 = smov 9  }
 0xaaa   : > { %v1657_v25 = vpop.permute.xlu2 %1656 }
 0xac2   : > { %v1660_v29 = vpop.permute.xlu0 %1659 }
 0xac3   : > { %v1654_v24 = vpop.permute.xlu1 %1653  ;;  %v1667_v31 = vsel %vm961_vm2, %v1657_v25, %v1660_v29 }
 0xac4   : > { %v1665_v26 = vsel %vm958_vm1, %v1654_v24, %v1650_v23 }
 0xac5   : > { %v1666_v27 = vsel %vm961_vm2, %v1665_v26, %v1657_v25  ;;  %v2304_v25 = vld [vmem:[%s3161_s24 + $0x8] sm:$0xff] }
 0xac6   : > { %v1669_v28 = vpack.c.bf16 %v1666_v27, %v1666_v27 }
 0xac8   : > { %1721 = vrot.lane.b32.xlu1 %v1669_v28, %s3254_s11  ;;  %1676 = vrot.lane.b32.xlu2 %v1669_v28, %s3201_s1  ;;  %v1704_v30 = vsel %vm1542_vm15, %v1669_v28, 0 }
 0xac9   : > { %1713 = vmatpush.bf16.msrb.mxu3 %v1704_v30 }
 0xacb   : > { %v1663_v32 = vpop.permute.xlu1 %1662 }
 0xacc   : > { %v1668_v33 = vsel %vm964_vm3, %v1667_v31, %v1663_v32  ;;  %2265 = vmatmul.msk.bf16.vlgmr.msrb.gmra.mxu3 %vm867_vm0, %v1670_v37 }
 0xacd   : > { %v1671_v34 = vpack.c.bf16 %v1668_v33, %v1668_v33 }
 0xacf   : > { %1678 = vrot.lane.b32.xlu0 %v1671_v34, %s3201_s1  ;;  %s3256_s1 = smov 125  }
 0xad0   : > { %1763 = vperm.xlu1 %2396, %v1758_v35   ;;  %1723 = vrot.lane.b32.xlu2 %v1671_v34, %s3254_s11 }
 0xad7   : > { %1748 = vperm.xlu0 %2359, %v1651_v36  }
 0xb22   : > { %v1677_v38 = vpop.permute.xlu2 %1676 }
 0xb2a   : > { %v1724_v39 = vpop.permute.xlu2 %1723 }
 0xb3a   : > { %v1722_v40 = vpop.permute.xlu1 %1721 }
 0xb3b   : > { %v1725_v41 = vsel %vm1080_vm12, %v1722_v40, %v1724_v39 }
 0xb3c   : > { %v1730_v42 = vsel %vm1542_vm15, %v1725_v41, 0 }
 0xb3d   : > { %1739 = vmatpush.bf16.msra.mxu0 %v1730_v42 }
 0xb40   : > { %2267 = vmatmul.msk.bf16.vlgmr.msra.gmra.mxu0 %vm867_vm0, %v2266_v43 }
 0xb41   : > { %v1679_v44 = vpop.permute.xlu0 %1678 }
 0xb42   : > { %v1680_v45 = vsel %vm1028_vm7, %v1677_v38, %v1679_v44  ;;  %v1764_v2 = vpop.permute.xlu1 %1763 }
 0xb43   : > { %v1685_v46 = vsel %vm1542_vm15, %v1680_v45, 0 }
 0xb44   : > { %1694 = vmatpush.bf16.msrb.mxu2 %v1685_v46 }
 0xb47   : > { %2264 = vmatmul.msk.bf16.vlgmr.msrb.gmra.mxu2 %vm867_vm0, %v2263_v47 }
 0xb49   : > { %v1749_v55 = vpop.permute.xlu0 %1748 }
 0xb4f   : > { %v1715_v48 = vpop.f32.mrf.mxu3 }
 0xb57   : > { %v1717_v49 = vpop.f32.mrf.mxu3 }
 0xbbd   : > { %v1741_v50 = vpop.f32.mrf.mxu0 }
 0xbc5   : > { %v1743_v51 = vpop.f32.mrf.mxu0 }
 0xbca   : > { %v1696_v52 = vpop.f32.mrf.mxu2 }
 0xbcb   : > { %v1716_v53 = vadd.f32 %v1715_v48, %v1696_v52 }
 0xbcd   : > { %v1745_v54 = vadd.f32 %v1741_v50, %v1716_v53 }
 0xbcf   : > { %v1751_v56 = vadd.f32 %v1749_v55, %v1745_v54 }
 0xbd1   : > { %v1753_v57 = vmin.f32 %v1751_v56, 0.0  ;;  %vm1752_vm13 = vcmp.gt.f32.partialorder %v1751_v56, 0.0 }
 0xbd2   : > { %v1698_v58 = vpop.f32.mrf.mxu2 }
 0xbd3   : > { %v1754_v59 = vmul.f32 1.442695, %v1753_v57 }
 0xbd5   : > { %2448 = vpow2.f32 %v1754_v59 }
 0xbdb   : > { %v2449_v60 = vpop.eup %2448 }
 0xbdc   : > { %v2268_v61 = vadd.f32 -1.0, %v2449_v60 }
 0xbde   : > { %v1757_v62 = vsel %vm1752_vm13, %v1751_v56, %v2268_v61 }
 0xbdf   : > { %v1760_v63 = vpack.c.bf16 %v1757_v62, %v1757_v62 }
 0xbe1   : > { %v1770_v0 = vsel %vm1192_vm14, %v1760_v63, 0 }
 0xbe2   : > { %1779 = vmatpush.bf16.msra.mxu1 %v1770_v0 }
 0xbe5   : > { %2269 = vmatmul.msk.bf16.vlgmr.msra.gmra.mxu1 %vm969_vm4, %v1759_v1 }
 0xc62   : > { %v1781_v3 = vpop.f32.mrf.mxu1 }
 0xc63   : > { %v1782_v4 = vadd.f32 %v1781_v3, %v1764_v2 }
 0xc65   : > { %v1785_v5 = vadd.f32 %v1782_v4, %v2969_v17 }
 0xc67   : > { %v1787_v6 = vmin.f32 %v1785_v5, 0.0  ;;  %vm1786_vm13 = vcmp.gt.f32.partialorder %v1785_v5, 0.0 }
 0xc69   : > { %v1788_v7 = vmul.f32 1.442695, %v1787_v6 }
 0xc6a   : > { %v1783_v8 = vpop.f32.mrf.mxu1 }
 0xc6b   : > { %2450 = vpow2.f32 %v1788_v7 }
 0xc71   : > { %v2451_v9 = vpop.eup %2450 }
 0xc72   : > { %v2270_v10 = vadd.f32 -1.0, %v2451_v9 }
 0xc74   : > { %v1791_v11 = vsel %vm1786_vm13, %v1785_v5, %v2270_v10 }
 0xc75   : > { %1798 = vrot.lane.b32.xlu0 %v1791_v11, %s3248_s28  ;;  %1795 = vrot.lane.b32.xlu2 %v1791_v11, %s3255_s6 }
 0xc7d   : > { %1868 = vperm.xlu0 %2359, %v1792_v12  }
 0xccf   : > { %v1796_v13 = vpop.permute.xlu2 %1795 }
 0xce7   : > { %v1799_v14 = vpop.permute.xlu0 %1798 }
 0xce8   : > { %v1801_v15 = vsel %vm958_vm1, %v1796_v13, %v1799_v14  ;;  %v1805_v16 = vpack.c.bf16 %v1799_v14, %v1799_v14 }
 0xce9   : > { %v1802_v17 = vpack.c.bf16 %v1801_v15, %v1801_v15 }
 0xcea   : > { %1818 = vrot.lane.b32.xlu2 %v1805_v16, %s3255_s6 }
 0xceb   : > { %1816 = vrot.lane.b32.xlu1 %v1802_v17, %s3255_s6  ;;  %v1850_v18 = vsel %vm1542_vm15, %v1802_v17, 0 }
 0xcec   : > { %1859 = vmatpush.bf16.msra.mxu3 %v1850_v18  ;;  %v1890_v18 = vld [vmem:[%s3164_s27] sm:$0xff] }
 0xcef   : > { %2282 = vmatmul.msk.bf16.vlgmr.msra.gmra.mxu3 %vm867_vm0, %v2303_v20  ;;  %v1869_v29 = vpop.permute.xlu0 %1868 }
 0xcf3   : > { %1873 = vperm.xlu1 %2396, %v1793_v19   ;;  %v1948_v19 = vld [vmem:[%s3163_s26] sm:$0xf] }
 0xd44   : > { %v1819_v21 = vpop.permute.xlu2 %1818 }
 0xd5d   : > { %v1817_v22 = vpop.permute.xlu1 %1816 }
 0xd5e   : > { %v1820_v23 = vsel %vm986_vm8, %v1817_v22, %v1819_v21 }
 0xd5f   : > { %v1825_v24 = vsel %vm1542_vm15, %v1820_v23, 0 }
 0xd60   : > { %1834 = vmatpush.bf16.msra.mxu2 %v1825_v24  ;;  %v2288_v24 = vld [vmem:[%s3163_s26 + $0x8] sm:$0xf] }
 0xd63   : > { %2277 = vmatmul.msk.bf16.vlgmr.msra.gmra.mxu2 %vm867_vm0, %v2304_v25 }
 0xd65   : > { %v1874_v36 = vpop.permute.xlu1 %1873 }
 0xd72   : > { %v1861_v26 = vpop.f32.mrf.mxu3 }
 0xd7a   : > { %v1863_v32 = vpop.f32.mrf.mxu3 }
 0xde6   : > { %v1836_v27 = vpop.f32.mrf.mxu2 }
 0xde7   : > { %v1862_v28 = vadd.f32 %v1861_v26, %v1836_v27 }
 0xde9   : > { %v1876_v30 = vadd.f32 %v1869_v29, %v1862_v28 }
 0xdeb   : > { %v1880_v31 = vmin.f32 %v1876_v30, 0.0  ;;  %vm1878_vm0 = vcmp.gt.f32.partialorder %v1876_v30, 0.0 }
 0xded   : > { %v1882_v34 = vmul.f32 1.442695, %v1880_v31  ;;  %v2285_v31 = vld [vmem:[%s3163_s26 + $0x4] sm:$0xf] }
 0xdee   : > { %v1838_v33 = vpop.f32.mrf.mxu2 }
 0xdef   : > { %v1864_v35 = vadd.f32 %v1863_v32, %v1838_v33  ;;  %2452 = vpow2.f32 %v1882_v34 }
 0xdf1   : > { %v1877_v37 = vadd.f32 %v1874_v36, %v1864_v35  ;;  %v2296_v36 = vld [vmem:[%s3163_s26 + $0x18] sm:$0xf] }
 0xdf3   : > { %v1881_v38 = vmin.f32 %v1877_v37, 0.0  ;;  %vm1879_vm14 = vcmp.gt.f32.partialorder %v1877_v37, 0.0 }
 0xdf5   : > { %v1884_v39 = vmul.f32 1.442695, %v1881_v38  ;;  %v2453_v40 = vpop.eup %2452 }
 0xdf6   : > { %v2283_v41 = vadd.f32 -1.0, %v2453_v40 }
 0xdf7   : > { %2454 = vpow2.f32 %v1884_v39 }
 0xdf8   : > { %v1888_v44 = vsel %vm1878_vm0, %v1876_v30, %v2283_v41  ;;  %v2290_v30 = vld [vmem:[%s3163_s26 + $0xc] sm:$0xf] }
 0xdfd   : > { %v2455_v42 = vpop.eup %2454 }
 0xdfe   : > { %v2284_v43 = vadd.f32 -1.0, %v2455_v42  ;;  %v2294_v42 = vld [vmem:[%s3163_s26 + $0x14] sm:$0xf] }
 0xe00   : > { %v1889_v45 = vsel %vm1879_vm14, %v1877_v37, %v2284_v43  ;;  %v2292_v43 = vld [vmem:[%s3163_s26 + $0x10] sm:$0xf] }
 0xe01   : > { %v2407_v46 = vpack.i.bf16 %v1889_v45, %v1888_v44 }
 0xe03   : > { %2408 = vrot.lane.b32.xlu1 %v2407_v46, %s3250_s3  ;;  %2403 = vrot.lane.b32.xlu0 %v2407_v46, %s3255_s6  ;;  %s3261_s3 = smov 122  }
 0xe04   : > { %2398 = vrot.lane.b32.xlu2 %v2407_v46, %s3256_s1 }
 0xe0b   : > { %2423 = vrot.lane.b32.xlu1 %v2407_v46, %s3257_s7  ;;  %2418 = vrot.lane.b32.xlu0 %v2407_v46, %s3248_s28  ;;  %s3260_s28 = smov 126  }
 0xe0c   : > { %2413 = vrot.lane.b32.xlu2 %v2407_v46, %s3258_s30 }
 0xe14   : > { %2428 = vrot.lane.b32.xlu2 %v2407_v46, %s3259_s9 }
 0xe5e   : > { %v2399_v47 = vpop.permute.xlu2 %2398 }
 0xe5f   : > { %v2401_v56 = vunpack.i.h.bf16 %v2399_v47  ;;  %v2400_v57 = vunpack.i.l.bf16 %v2399_v47 }
 0xe66   : > { %v2414_v48 = vpop.permute.xlu2 %2413 }
 0xe67   : > { %v2416_v58 = vunpack.i.h.bf16 %v2414_v48  ;;  %v2415_v59 = vunpack.i.l.bf16 %v2414_v48 }
 0xe6e   : > { %v2429_v51 = vpop.permute.xlu2 %2428 }
 0xe6f   : > { %v2431_v60 = vunpack.i.h.bf16 %v2429_v51  ;;  %v2430_v61 = vunpack.i.l.bf16 %v2429_v51 }
 0xe75   : > { %v2409_v49 = vpop.permute.xlu1 %2408  ;;  %v2404_v50 = vpop.permute.xlu0 %2403 }
 0xe76   : > { %v2411_v52 = vunpack.i.h.bf16 %v2409_v49  ;;  %v2410_v53 = vunpack.i.l.bf16 %v2409_v49  ;;  %v2406_v54 = vunpack.i.h.bf16 %v2404_v50  ;;  %v2405_v55 = vunpack.i.l.bf16 %v2404_v50 }
 0xe78   : > { %v1941_v4 = vsel %vm964_vm3, %v2410_v53, %v2415_v59  ;;  %v1942_v5 = vsel %vm964_vm3, %v2411_v52, %v2416_v58  ;;  %v1935_v6 = vsel %vm958_vm1, %v2400_v57, %v2405_v55  ;;  %v1936_v7 = vsel %vm958_vm1, %v2401_v56, %v2406_v54 }
 0xe7d   : > { %v2424_v62 = vpop.permute.xlu1 %2423  ;;  %v2419_v63 = vpop.permute.xlu0 %2418 }
 0xe7e   : > { %v2426_v0 = vunpack.i.h.bf16 %v2424_v62  ;;  %v2425_v1 = vunpack.i.l.bf16 %v2424_v62  ;;  %v2421_v2 = vunpack.i.h.bf16 %v2419_v63  ;;  %v2420_v3 = vunpack.i.l.bf16 %v2419_v63 }
 0xe80   : > { %v1943_v8 = vsel %vm969_vm4, %v1941_v4, %v2425_v1  ;;  %v1944_v9 = vsel %vm969_vm4, %v1942_v5, %v2426_v0  ;;  %v1937_v10 = vsel %vm961_vm2, %v1935_v6, %v2420_v3  ;;  %v1938_v11 = vsel %vm961_vm2, %v1936_v7, %v2421_v2 }
 0xe81   : > { %v1945_v12 = vsel %vm972_vm5, %v1943_v8, %v2430_v61  ;;  %v1946_v13 = vsel %vm972_vm5, %v1944_v9, %v2431_v60  ;;  %v1939_v14 = vsel %vm964_vm3, %v1937_v10, %v2410_v53  ;;  %v1940_v15 = vsel %vm964_vm3, %v1938_v11, %v2411_v52 }
 0xe82   : > { %v1949_v16 = vpack.c.bf16 %v1946_v13, %v1945_v12  ;;  %v1947_v17 = vpack.c.bf16 %v1940_v15, %v1939_v14 }
 0xe84   : > { %1996 = vrot.lane.b32.xlu1 %v1949_v16, %s3260_s28  ;;  %1954 = vrot.lane.b32.xlu2 %v1947_v17, %s3255_s6 }
 0xe85   : > { %1994 = vrot.lane.b32.xlu0 %v1947_v17, %s3260_s28  ;;  %1986 = vmatpush.bf16.msrb.mxu1 %v1947_v17  ;;  %s849_s28 = sand.u32 1, %s2510_s5  }
 0xe88   : > { %2287 = vmatmul.msk.bf16.vlgmr.msrb.gmra.mxu1 %vm989_vm6, %v1948_v19 }
 0xe8c   : > { %2019 = vrot.lane.b32.xlu1 %v1947_v17, %s3256_s1  ;;  %2021 = vrot.lane.b32.xlu2 %v1949_v16, %s3256_s1  ;;  %s3264_s1 = sld [smem:[#allocation28_spill]] }
 0xe8d   : > { %1956 = vrot.lane.b32.xlu0 %v1949_v16, %s3255_s6 }
 0xe92   : > { %s2476_s0 = scalar_lea.hbm %s3264_s1, 16 }
 0xe94   : > { %2096 = vrot.lane.b32.xlu1 %v1949_v16, %s3261_s3  ;;  %2044 = vrot.lane.b32.xlu2 %v1947_v17, %s3254_s11 }
 0xe95   : > { %2094 = vrot.lane.b32.xlu0 %v1947_v17, %s3261_s3  ;;  %s2215_s3 = sshll.u32 %s849_s28, 3 }
 0xe96   : > { %s851_s6 = scalar_lea.vmem [#allocation2], %s2215_s3 }
 0xe97   : > { %s2137_s9 = sshll.u32 %s851_s6, 4  ;;  %s2138_s9 = int_to_ptr.vmem [resolvable:$true] %s2137_s9 }
 0xe9c   : > { %2069 = vrot.lane.b32.xlu1 %v1947_v17, %s3262_s8  ;;  %2071 = vrot.lane.b32.xlu2 %v1949_v16, %s3262_s8 }
 0xe9d   : > { %2046 = vrot.lane.b32.xlu0 %v1949_v16, %s3254_s11  ;;  %s3263_s11 = sld [smem:[#allocation8_spill]] }
 0xea3   : > { %s2299_s8 = sshll.u32 %s3263_s11, 3  ;;  %s2125_s11 = scalar_lea.sflag [#allocation3], %s849_s28 }
 0xea4   : > { %s2135_s30 = scalar_lea.hbm %s3264_s1, %s2299_s8 }
 0xea5   : > { %2119 = vperm.xlu0 %2359, %v1890_v18   ;;  %s2139_s4 = sshll.u32 %s2135_s30, 4  ;;  %s2140_s4 = int_to_ptr.hbm [resolvable:$true] %s2139_s4 }
 0xea6   : > { %s2470_s10 = sshra.s32 %s2140_s4, 4  ;;  %s2471_s10 = int_to_ptr.hbm [resolvable:$true] %s2470_s10 }
 0xea7   : > { %s2472_s12 = scalar_lea.hbm %s2471_s10, 8  ;;  %p2477_p0 = scmp.lt.s32.totalorder %s2471_s10, %s3264_s1 }
 0xea8   : > { %p2473_p11 = scmp.ne.s32.totalorder %s2471_s10, %s2472_s12  ;;  %p2478_p1 = scmp.lt.s32.totalorder %s2476_s0, %s2472_s12 }
 0xeaa   : > { %p2474_p12 = pnand %p2473_p11, %p2718_p5  ;;  %p2479_p2 = por %p2478_p1, %p2477_p0 }
 0xeac   : > { %p2475_p13 = pneg %p2474_p12 }
 0xeae   : > { %p2480_p3 = pnand %p2479_p2, %p2475_p13 }
 0xede   : > { %v1955_v20 = vpop.permute.xlu2 %1954 }
 0xee6   : > { %v2022_v25 = vpop.permute.xlu2 %2021 }
 0xeee   : > { %v2045_v32 = vpop.permute.xlu2 %2044 }
 0xef6   : > { %v1997_v21 = vpop.permute.xlu1 %1996  ;;  %v2072_v37 = vpop.permute.xlu2 %2071 }
 0xef7   : > { %v1995_v22 = vpop.permute.xlu0 %1994 }
 0xef8   : > { %v1998_v23 = vsel %vm1028_vm7, %v1995_v22, %v1997_v21 }
 0xef9   : > { %2010 = vmatpush.bf16.msrb.mxu2 %v1998_v23 }
 0xefc   : > { %2289 = vmatmul.msk.bf16.vlgmr.msrb.gmra.mxu2 %vm989_vm6, %v2288_v24 }
 0xefe   : > { %v2020_v26 = vpop.permute.xlu1 %2019 }
 0xeff   : > { %v2023_v27 = vsel %vm1054_vm10, %v2020_v26, %v2022_v25  ;;  %v1957_v28 = vpop.permute.xlu0 %1956 }
 0xf00   : > { %v1958_v29 = vsel %vm986_vm8, %v1955_v20, %v1957_v28  ;;  %2035 = vmatpush.bf16.msrb.mxu3 %v2023_v27 }
 0xf01   : > { %1970 = vmatpush.bf16.msrb.mxu0 %v1958_v29 }
 0xf03   : > { %2291 = vmatmul.msk.bf16.vlgmr.msrb.gmra.mxu3 %vm989_vm6, %v2290_v30 }
 0xf04   : > { %2286 = vmatmul.msk.bf16.vlgmr.msrb.gmra.mxu0 %vm989_vm6, %v2285_v31 }
 0xf05   : > { %v1988_v44 = vpop.f32.mrf.mxu1 }
 0xf06   : > { %v2097_v33 = vpop.permute.xlu1 %2096 }
 0xf07   : > { %v2095_v34 = vpop.permute.xlu0 %2094 }
 0xf08   : > { %v2098_v35 = vsel %vm1132_vm11, %v2095_v34, %v2097_v33 }
 0xf09   : > { %2110 = vmatpush.bf16.msra.mxu2 %v2098_v35 }
 0xf0c   : > { %2297 = vmatmul.msk.bf16.vlgmr.msra.gmra.mxu2 %vm989_vm6, %v2296_v36 }
 0xf0d   : > { %v1990_v45 = vpop.f32.mrf.mxu1 }
 0xf0e   : > { %v2070_v38 = vpop.permute.xlu1 %2069 }
 0xf0f   : > { %v2073_v39 = vsel %vm1106_vm9, %v2070_v38, %v2072_v37  ;;  %v2047_v40 = vpop.permute.xlu0 %2046 }
 0xf10   : > { %v2048_v41 = vsel %vm1080_vm12, %v2045_v32, %v2047_v40  ;;  %2085 = vmatpush.bf16.msra.mxu1 %v2073_v39 }
 0xf11   : > { %2060 = vmatpush.bf16.msra.mxu0 %v2048_v41 }
 0xf13   : > { %2295 = vmatmul.msk.bf16.vlgmr.msra.gmra.mxu1 %vm989_vm6, %v2294_v42 }
 0xf14   : > { %2293 = vmatmul.msk.bf16.vlgmr.msra.gmra.mxu0 %vm989_vm6, %v2292_v43 }
 0xf17   : > { %v2120_v61 = vpop.permute.xlu0 %2119 }
 0xf7f   : > { %v2012_v46 = vpop.f32.mrf.mxu2 }
 0xf81   : > { %v1972_v47 = vpop.f32.mrf.mxu0 }
 0xf82   : > { %v1989_v51 = vadd.f32 %v1988_v44, %v1972_v47 }
 0xf84   : > { %v2016_v52 = vadd.f32 %v2012_v46, %v1989_v51 }
 0xf86   : > { %v2037_v48 = vpop.f32.mrf.mxu3 }
 0xf87   : > { %v2014_v49 = vpop.f32.mrf.mxu2  ;;  %v2041_v55 = vadd.f32 %v2037_v48, %v2016_v52 }
 0xf89   : > { %v1974_v50 = vpop.f32.mrf.mxu0 }
 0xf8e   : > { %v2039_v53 = vpop.f32.mrf.mxu3 }
 0xf8f   : > { %v2112_v54 = vpop.f32.mrf.mxu2 }
 0xf90   : > { %v2087_v56 = vpop.f32.mrf.mxu1 }
 0xf91   : > { %v2062_v57 = vpop.f32.mrf.mxu0 }
 0xf92   : > { %v2066_v58 = vadd.f32 %v2062_v57, %v2041_v55 }
 0xf94   : > { %v2091_v59 = vadd.f32 %v2087_v56, %v2066_v58 }
 0xf96   : > { %v2116_v60 = vadd.f32 %v2112_v54, %v2091_v59 }
 0xf97   : > { %v2114_v62 = vpop.f32.mrf.mxu2 }
 0xf98   : > { %v2122_v63 = vadd.f32 %v2120_v61, %v2116_v60  ;;  %v2089_v0 = vpop.f32.mrf.mxu1 }
 0xf99   : > { %v2064_v1 = vpop.f32.mrf.mxu0 }
 0xf9a   : > { %2123 = vst [vmem:[%s851_s6] sm:$0xff] %v2122_v63 }
 0xf9b   : > { %2483 = shalt.err (!%p2480_p3)
}
 0xf9c   : > { %2305 = dma.vmem_to_hbm [thread:$0]  (%p2718_p5), %s2138_s9, 128, %s2140_s4, %s2125_s11  }
 0xf9d PF: > { %s3266_s28 = sld [smem:[#allocation7_spill]] }
 0xf9e   : > { %s3267_s6 = sld [smem:[#allocation5_spill]] }
 0xfa3   : > { %p2311_p4 = scmp.ge.s32.totalorder %s3266_s28, 2 }
 0xfa4   : > { %s2151_s14 = sand.u32 1, %s3267_s6  }
 0xfa5   : > { %p2308_p7 = pnand %p2311_p4, %p2722_p6  ;;  %s2152_s3 = scalar_lea.sflag [#allocation3], %s2151_s14 }
 0xfa7   : > { %p2309_p8 = pneg %p2308_p7 }
 0xfa9   : > { %2501 = dma.done.wait (%p2309_p8), %s2152_s3, 128  }
 0xfaa   : > { %2503 = vsyncadd (%p2309_p8), %s2152_s3, 4294967168  ;;  %s3269_s30 = sld [smem:[#allocation9_spill]]  ;;  %s3272_s8 = smov %s2510_s5 }
 0xfab   : > { %s3270_s12 = sld [smem:[#allocation6_spill]] }
 0xfac   : > { %s3271_s9 = sld [smem:[#allocation10_spill]] }
 0xfb0   : > { %p38_p9 = scmp.ge.s32.totalorder %s3269_s30, 4  }
 0xfb1   : > { %s3273_s5 = smov %s3270_s12 }
 0xfb2   :  { %40 = sbr.rel (!%p38_p9) target bundleno = 20 (0x14), region = 192 }
 0xfb7   :  { %2158 = vsyncpa [#allocation3], 1 }
 0xfb8   :  { %2160 = vsyncpa [#allocation3 + $0x1], 1 }

</bundles_post_ra>
